<compile_context>
chip_gen: v7x
topology: tpu7x:2x2x1
jax: 0.10.0
libtpu: 0.0.40
codegen_flags: <defaults>
</compile_context>

<pallas_src>
import functools

import jax
import jax.numpy as jnp
from jax.experimental import pallas as pl
from jax.experimental.pallas import tpu as pltpu


# ---------------------------------------------------------------------------
# Pallas kernel: in-VMEM 8-shift assembly -> bf16 GEMM (f32 acc) -> epilogue
# ---------------------------------------------------------------------------
def _make_kernel(db, H, W, Cin):
    hw = H * W

    def kernel(x_ref, b_ref, cb_ref, eb1_ref, o_ref):
        # x_ref  : (D+1, H+1, W+1, Cin) f32  padded channels-last input, one n
        # b_ref  : (8*Cin, 8*Cout) bf16      phase-routed weights (resident)
        # cb_ref : (1, 8*Cout) f32           conv bias per (phase, co)
        # eb1_ref: (1, 8*Cout) f32           extra bias + 1 per (phase, co)
        # o_ref  : (db*H*W, 8*Cout)          output rows for this (n, depth-block)
        d0 = pl.program_id(1) * db
        win = x_ref[pl.ds(d0, db + 1), :, :, :]          # (db+1, H+1, W+1, Cin)
        parts = []
        for sd in (0, 1):
            for sh in (0, 1):
                for sw in (0, 1):
                    parts.append(win[sd:sd + db, sh:sh + H, sw:sw + W, :])
        a = jnp.concatenate(parts, axis=3)               # (db, H, W, 8*Cin)
        a = a.reshape(db * hw, 8 * Cin).astype(jnp.bfloat16)
        z = jnp.dot(a, b_ref[...], preferred_element_type=jnp.float32)
        z = z + cb_ref[...]                              # ConvTranspose3d bias
        # (x + b + x) * x + x  ==  x * (2x + (b + 1))
        o_ref[...] = (z * (2.0 * z + eb1_ref[...])).astype(o_ref.dtype)

    return kernel


def _resident_spec(shape):
    """BlockSpec for a grid-invariant operand; single-buffered when supported."""
    kwargs = {}
    if hasattr(pl, "Buffered"):
        kwargs["pipeline_mode"] = pl.Buffered(1)
    return pl.BlockSpec(shape, lambda n, d: (0,) * len(shape), **kwargs)


def fused_convt_gemm(x_pad, b_mat, cbias, eb1, *, d_block, out_dtype=jnp.float32):
    """x_pad:(N,D+1,H+1,W+1,Cin) f32, b_mat:(8Cin,8Cout) bf16, biases:(1,8Cout) f32
    -> (N*D*H*W, 8*Cout) rows ordered (n,i,j,k), cols ordered (pd,ph,pw,co)."""
    N, Dp1, Hp1, Wp1, Cin = x_pad.shape
    D, H, W = Dp1 - 1, Hp1 - 1, Wp1 - 1
    K, Nc = b_mat.shape
    assert K == 8 * Cin and D % d_block == 0
    rows = d_block * H * W
    assert rows % 8 == 0 and Nc % 128 == 0, "out tile must be (8,128)-aligned"
    M = N * D * H * W
    n_dblk = D // d_block

    flops = 2 * M * K * Nc + 3 * M * Nc
    bytes_accessed = (x_pad.size * x_pad.dtype.itemsize
                      + b_mat.size * b_mat.dtype.itemsize
                      + 2 * Nc * 4
                      + M * Nc * jnp.dtype(out_dtype).itemsize)

    return pl.pallas_call(
        _make_kernel(d_block, H, W, Cin),
        out_shape=jax.ShapeDtypeStruct((M, Nc), out_dtype),
        grid_spec=pltpu.PrefetchScalarGridSpec(
            num_scalar_prefetch=0,
            grid=(N, n_dblk),
            in_specs=[
                # whole padded slab per batch element; re-fetched only when n changes
                pl.BlockSpec((None, Dp1, Hp1, Wp1, Cin),
                             lambda n, d: (n, 0, 0, 0, 0)),
                _resident_spec((K, Nc)),      # weights
                _resident_spec((1, Nc)),      # conv bias
                _resident_spec((1, Nc)),      # extra bias + 1
            ],
            out_specs=pl.BlockSpec((rows, Nc),
                                   lambda n, d: (n * n_dblk + d, 0)),
        ),
        compiler_params=pltpu.CompilerParams(
            dimension_semantics=("parallel", "parallel"),
            vmem_limit_bytes=32 * 1024 * 1024,
        ),
        cost_estimate=pl.CostEstimate(
            flops=flops, transcendentals=0, bytes_accessed=bytes_accessed),
    )(x_pad, b_mat, cbias, eb1)


# ---------------------------------------------------------------------------
# Glue: stride-2 phase decomposition of ConvTranspose3d (k=3, p=1, op=1)
# ---------------------------------------------------------------------------
# For od = 2*i + p (p = output parity), contributions come from input index
# i + s (s = shift in {0,1}) through kernel tap k:
#   p=0: s=0 -> k=1        p=1: s=0 -> k=2, s=1 -> k=0
_TAP = {(0, 0): 1, (1, 0): 2, (1, 1): 0}


def _phase_weight(weight):
    """weight:(Cin,Cout,3,3,3) -> B:(8*Cin,8*Cout); rows=(shift,ci), cols=(phase,co)."""
    Cin, Cout = weight.shape[0], weight.shape[1]
    zeros = jnp.zeros((Cin, Cout), weight.dtype)
    rows = []
    for sd in (0, 1):
        for sh in (0, 1):
            for sw in (0, 1):
                cols = []
                for pd in (0, 1):
                    for ph in (0, 1):
                        for pw in (0, 1):
                            kd = _TAP.get((pd, sd))
                            kh = _TAP.get((ph, sh))
                            kw = _TAP.get((pw, sw))
                            if kd is None or kh is None or kw is None:
                                cols.append(zeros)
                            else:
                                cols.append(weight[:, :, kd, kh, kw])
                rows.append(jnp.concatenate(cols, axis=1))   # (Cin, 8*Cout)
    return jnp.concatenate(rows, axis=0)                     # (8*Cin, 8*Cout)


def _pick_d_block(N, D, H, W):
    """Largest depth block keeping >=4 grid steps and a modest out tile."""
    best = 1
    for db in range(1, D + 1):
        if D % db:
            continue
        if db * H * W > 1024:                 # (rows, 512) f32 tile <= 2 MiB
            continue
        if db > 1 and N * (D // db) < 4:      # >=2 steps per core on v7x
            continue
        best = db
    return best


@functools.partial(jax.jit,
                   static_argnames=("d_block", "interleave_output", "out_dtype"))
def model_forward(x, weight, conv_bias, extra_bias, *, d_block=None,
                  interleave_output=True, out_dtype=jnp.float32):
    """x:(N,Cin,D,H,W) NCDHW -> (N,Cout,2D,2H,2W) NCDHW (default).

    Implements the fixed module config kernel=3, stride=2, padding=1,
    output_padding=1 (the phase decomposition is specialized to it).
    """
    N, Cin, D, H, W = x.shape
    Cout = weight.shape[1]
    if d_block is None:
        d_block = _pick_d_block(N, D, H, W)

    # NCDHW -> padded NDHWC (single fused XLA pad+transpose; the +1 far-end halo
    # is all this transposed conv ever reads).
    # TODO(synk): fold this input relayout into the kernel too (needs an
    # in-kernel Cin->lane transpose); ~2% of total HBM traffic here.
    xt = jnp.transpose(x, (0, 2, 3, 4, 1)).astype(jnp.float32)
    x_pad = jnp.pad(xt, ((0, 0), (0, 1), (0, 1), (0, 1), (0, 0)))

    b_mat = _phase_weight(weight).astype(jnp.bfloat16)
    cbias = jnp.tile(conv_bias.reshape(-1).astype(jnp.float32), 8).reshape(1, 8 * Cout)
    eb1 = jnp.tile(extra_bias.reshape(-1).astype(jnp.float32) + 1.0, 8).reshape(1, 8 * Cout)

    out2d = fused_convt_gemm(x_pad, b_mat, cbias, eb1,
                             d_block=d_block, out_dtype=out_dtype)

    out8 = out2d.reshape(N, D, H, W, 2, 2, 2, Cout)
    if not interleave_output:
        return out8    # zero-copy phase-factored layout for fused consumers
    # TODO(synk): one remaining XLA pass (read+write of the output) to interleave
    # the 8 phases back into NCDHW.
    out = jnp.transpose(out8, (0, 7, 1, 4, 2, 5, 3, 6))      # (N,Cout,D,2,H,2,W,2)
    return out.reshape(N, Cout, 2 * D, 2 * H, 2 * W)


if __name__ == "__main__":
    in_channels = 32
    out_channels = 64
    kernel_size = 3
    stride = 2
    padding = 1
    output_padding = 1
    batch_size = 2
    D = H = W = 8            # output spatial 16 -> M = 2*8*8*8 = 1024 rows

    key = jax.random.PRNGKey(0)
    kx, kw, kb, ke = jax.random.split(key, 4)

    x = jax.random.normal(kx, (batch_size, in_channels, D, H, W), jnp.float32)
    # PyTorch ConvTranspose3d weight layout: (Cin, Cout, kD, kH, kW)
    weight = jax.random.normal(
        kw, (in_channels, out_channels, kernel_size, kernel_size, kernel_size),
        jnp.float32) * 0.05
    conv_bias = jax.random.normal(kb, (out_channels,), jnp.float32) * 0.05
    extra_bias = jax.random.normal(ke, (out_channels, 1, 1, 1), jnp.float32)

    out = model_forward(x, weight, conv_bias, extra_bias)
    out = jax.block_until_ready(out)

    # ---- reference: same bf16-quantized operands, full-precision f32 conv ----
    xq = x.astype(jnp.bfloat16).astype(jnp.float32)
    wq = weight.astype(jnp.bfloat16).astype(jnp.float32)
    rhs = jnp.transpose(wq[:, :, ::-1, ::-1, ::-1], (1, 0, 2, 3, 4))  # (Cout,Cin,k,k,k)
    lo = kernel_size - 1 - padding
    hi = lo + output_padding
    z = jax.lax.conv_general_dilated(
        xq, rhs, window_strides=(1, 1, 1), padding=[(lo, hi)] * 3,
        lhs_dilation=(stride, stride, stride),
        dimension_numbers=("NCDHW", "OIDHW", "NCDHW"),
        precision=jax.lax.Precision.HIGHEST)
    z = z + conv_bias.reshape(1, -1, 1, 1, 1)
    bfull = extra_bias.reshape(1, -1, 1, 1, 1)
    ref = (z + bfull + z) * z + z

    assert out.shape == (batch_size, out_channels, 2 * D, 2 * H, 2 * W)
    assert out.shape == ref.shape
    assert bool(jnp.allclose(out, ref, rtol=5e-3, atol=5e-3)), (
        f"max abs err {float(jnp.max(jnp.abs(out - ref)))}")

    print("KERNEL_OK")
</pallas_src>

<mosaic_0001>
module attributes {stable_mosaic.version = 11 : i64} {
  func.func @kernel(%arg0: i32, %arg1: i32, %arg2: memref<1x9x9x9x32xf32, #tpu.memory_space<vmem>>, %arg3: memref<256x512xbf16, #tpu.memory_space<vmem>>, %arg4: memref<1x512xf32, #tpu.memory_space<vmem>>, %arg5: memref<1x512xf32, #tpu.memory_space<vmem>>, %arg6: memref<256x512xf32, #tpu.memory_space<vmem>>) attributes {dimension_semantics = [#tpu.dimension_semantics<parallel>, #tpu.dimension_semantics<parallel>], iteration_bounds = array<i64: 2, 2>, scalar_prefetch = 0 : i64, scratch_operands = 0 : i64, tpu.core_type = #tpu.core_type<tc>, window_params = [{transform_indices = @transform_0, window_bounds = array<i64: 1, 9, 9, 9, 32>}, {pipeline_mode = #tpu.pipeline_mode<synchronous>, transform_indices = @transform_1, window_bounds = array<i64: 256, 512>}, {pipeline_mode = #tpu.pipeline_mode<synchronous>, transform_indices = @transform_2, window_bounds = array<i64: 1, 512>}, {pipeline_mode = #tpu.pipeline_mode<synchronous>, transform_indices = @transform_3, window_bounds = array<i64: 1, 512>}, {transform_indices = @transform_4, window_bounds = array<i64: 256, 512>}]} {
    %c4_i32 = arith.constant 4 : i32
    %0 = arith.muli %arg1, %c4_i32 : i32
    %c0 = arith.constant 0 : index
    %1 = arith.index_cast %0 : i32 to index
    %c0_0 = arith.constant 0 : index
    %c0_1 = arith.constant 0 : index
    %c0_2 = arith.constant 0 : index
    %2 = vector.load %arg2[%c0, %1, %c0_0, %c0_1, %c0_2] : memref<1x9x9x9x32xf32, #tpu.memory_space<vmem>>, vector<1x5x9x9x32xf32>
    %3 = vector.shape_cast %2 : vector<1x5x9x9x32xf32> to vector<5x9x9x32xf32>
    %4 = vector.extract_strided_slice %3 {offsets = [0, 0, 0, 0], sizes = [4, 8, 8, 32], strides = [1, 1, 1, 1]} : vector<5x9x9x32xf32> to vector<4x8x8x32xf32>
    %5 = vector.extract_strided_slice %3 {offsets = [0, 0, 1, 0], sizes = [4, 8, 8, 32], strides = [1, 1, 1, 1]} : vector<5x9x9x32xf32> to vector<4x8x8x32xf32>
    %6 = vector.extract_strided_slice %3 {offsets = [0, 1, 0, 0], sizes = [4, 8, 8, 32], strides = [1, 1, 1, 1]} : vector<5x9x9x32xf32> to vector<4x8x8x32xf32>
    %7 = vector.extract_strided_slice %3 {offsets = [0, 1, 1, 0], sizes = [4, 8, 8, 32], strides = [1, 1, 1, 1]} : vector<5x9x9x32xf32> to vector<4x8x8x32xf32>
    %8 = vector.extract_strided_slice %3 {offsets = [1, 0, 0, 0], sizes = [4, 8, 8, 32], strides = [1, 1, 1, 1]} : vector<5x9x9x32xf32> to vector<4x8x8x32xf32>
    %9 = vector.extract_strided_slice %3 {offsets = [1, 0, 1, 0], sizes = [4, 8, 8, 32], strides = [1, 1, 1, 1]} : vector<5x9x9x32xf32> to vector<4x8x8x32xf32>
    %10 = vector.extract_strided_slice %3 {offsets = [1, 1, 0, 0], sizes = [4, 8, 8, 32], strides = [1, 1, 1, 1]} : vector<5x9x9x32xf32> to vector<4x8x8x32xf32>
    %11 = vector.extract_strided_slice %3 {offsets = [1, 1, 1, 0], sizes = [4, 8, 8, 32], strides = [1, 1, 1, 1]} : vector<5x9x9x32xf32> to vector<4x8x8x32xf32>
    %12 = tpu.concatenate %4, %5, %6, %7, %8, %9, %10, %11 in 3 : vector<4x8x8x32xf32>, vector<4x8x8x32xf32>, vector<4x8x8x32xf32>, vector<4x8x8x32xf32>, vector<4x8x8x32xf32>, vector<4x8x8x32xf32>, vector<4x8x8x32xf32>, vector<4x8x8x32xf32> -> vector<4x8x8x256xf32>
    %13 = vector.shape_cast %12 : vector<4x8x8x256xf32> to vector<256x256xf32>
    %14 = arith.truncf %13 : vector<256x256xf32> to vector<256x256xbf16>
    %c0_3 = arith.constant 0 : index
    %c0_4 = arith.constant 0 : index
    %15 = vector.load %arg3[%c0_3, %c0_4] : memref<256x512xbf16, #tpu.memory_space<vmem>>, vector<256x512xbf16>
    %cst = arith.constant dense<0.000000e+00> : vector<256x512xf32>
    %16 = tpu.matmul %14, %15, %cst {dimension_numbers = #tpu.dot_dimension_numbers<[1], [0], [0], [1], [0, 0, 1, 1], [], []>} : vector<256x256xbf16>, vector<256x512xbf16>, vector<256x512xf32> -> vector<256x512xf32>
    %c0_5 = arith.constant 0 : index
    %c0_6 = arith.constant 0 : index
    %17 = vector.load %arg4[%c0_5, %c0_6] : memref<1x512xf32, #tpu.memory_space<vmem>>, vector<1x512xf32>
    %18 = vector.broadcast %17 : vector<1x512xf32> to vector<256x512xf32>
    %19 = arith.addf %16, %18 : vector<256x512xf32>
    %cst_7 = arith.constant 2.000000e+00 : f32
    %20 = vector.broadcast %cst_7 : f32 to vector<256x512xf32>
    %21 = arith.mulf %20, %19 : vector<256x512xf32>
    %c0_8 = arith.constant 0 : index
    %c0_9 = arith.constant 0 : index
    %22 = vector.load %arg5[%c0_8, %c0_9] : memref<1x512xf32, #tpu.memory_space<vmem>>, vector<1x512xf32>
    %23 = vector.broadcast %22 : vector<1x512xf32> to vector<256x512xf32>
    %24 = arith.addf %21, %23 : vector<256x512xf32>
    %25 = arith.mulf %19, %24 : vector<256x512xf32>
    %c0_10 = arith.constant 0 : index
    %c0_11 = arith.constant 0 : index
    %26 = vector.load %arg6[%c0_10, %c0_11] : memref<256x512xf32, #tpu.memory_space<vmem>>, vector<256x512xf32>
    tpu.vector_store %arg6[%c0_10, %c0_11], %25 {strides = array<i32>} : memref<256x512xf32, #tpu.memory_space<vmem>>, vector<256x512xf32>,
    return
  }
  func.func @transform_0(%arg0: i32, %arg1: i32) -> (i32, i32, i32, i32, i32) {
    %c0_i32 = arith.constant 0 : i32
    %c0_i32_0 = arith.constant 0 : i32
    %c0_i32_1 = arith.constant 0 : i32
    %c0_i32_2 = arith.constant 0 : i32
    %c0_i32_3 = arith.constant 0 : i32
    return %arg0, %c0_i32, %c0_i32_0, %c0_i32_1, %c0_i32_2 : i32, i32, i32, i32, i32
  }
  func.func @transform_1(%arg0: i32, %arg1: i32) -> (i32, i32) {
    %c0_i32 = arith.constant 0 : i32
    %c0_i32_0 = arith.constant 0 : i32
    %c0_i32_1 = arith.constant 0 : i32
    return %c0_i32, %c0_i32_0 : i32, i32
  }
  func.func @transform_2(%arg0: i32, %arg1: i32) -> (i32, i32) {
    %c0_i32 = arith.constant 0 : i32
    %c0_i32_0 = arith.constant 0 : i32
    %c0_i32_1 = arith.constant 0 : i32
    return %c0_i32, %c0_i32_0 : i32, i32
  }
  func.func @transform_3(%arg0: i32, %arg1: i32) -> (i32, i32) {
    %c0_i32 = arith.constant 0 : i32
    %c0_i32_0 = arith.constant 0 : i32
    %c0_i32_1 = arith.constant 0 : i32
    return %c0_i32, %c0_i32_0 : i32, i32
  }
  func.func @transform_4(%arg0: i32, %arg1: i32) -> (i32, i32) {
    %c2_i32 = arith.constant 2 : i32
    %0 = arith.muli %arg0, %c2_i32 : i32
    %1 = arith.addi %0, %arg1 : i32
    %c0_i32 = arith.constant 0 : i32
    %c0_i32_0 = arith.constant 0 : i32
    return %1, %c0_i32 : i32, i32
  }
}

</mosaic_0001>

<bundles_post_ra>
// kernel: tile.18
= control target key start
LH: loop header
LB: loop body
LE: loop exit
PB: predicated region body
PF: predicated region fallthrough
CT: control target
= control target key end

     0   :  { %s22_s0 = inlined_call_operand.vmem [shape: f32[64], index: 0, kind: input, shape index: {}]   ;;  %s23_s1 = inlined_call_operand.vmem [shape: f32[8,64], index: 1, kind: output, shape index: {}]  }
   0x1   :  { %v4_v0 = vld [vmem:[%s22_s0] ss:$0 sm:$0xff] }
   0x2   :  { %5 = vst [vmem:[%s23_s1] sm:$0xff] %v4_v0 }

// kernel: tile.19
= control target key start
LH: loop header
LB: loop body
LE: loop exit
PB: predicated region body
PF: predicated region fallthrough
CT: control target
= control target key end

     0   :  { %vm3_vm0 = vcmask 523264   ;;  %s41_s8 = smov 64   ;;  %vm9_vm1 = vcmask 1048064   ;;  %s70_s0 = inlined_call_operand.vmem [shape: f32[8,64], index: 0, kind: input, shape index: {}]   ;;  %s71_s1 = inlined_call_operand.vmem [shape: f32[1,512], index: 1, kind: output, shape index: {}]  }
   0x1   :  { %v36_v0 = vld [vmem:[%s70_s0 + $0x1] ss:$2 sm:$0xf]   ;;  %v2_v1 = vld [vmem:[%s70_s0] ss:$2 sm:$0xf]  }
   0x2   :  { %7 = vrot.lane.b32.xlu0 %v36_v0, %s41_s8  ;;  %4 = vst.msk [vmem:[#allocation0] ss:$8 sm:$0xf] %vm3_vm0, %v2_v1  }
  0x74   :  { %v8_v2 = vpop.permute.xlu0 %7  }
  0x75   :  { %10 = vst.msk [vmem:[#allocation0] ss:$8 sm:$0xf] %vm9_vm1, %v8_v2  }
  0x7c   :  { %v14_v3 = vld [vmem:[#allocation0] sm:$0x1]  ;;  %v18_v4 = vld [vmem:[#allocation0 + $0x8] sm:$0x1]  ;;  %v23_v5 = vld [vmem:[#allocation0 + $0x10] sm:$0x1] }
  0x7d   :  { %16 = vst [vmem:[%s71_s1] sm:$0x1] %v14_v3  ;;  %37 = vst [vmem:[%s71_s1 + $0x1] sm:$0x1] %v18_v4  ;;  %v29_v6 = vld [vmem:[#allocation0 + $0x18] sm:$0x1] }
  0x7e   :  { %38 = vst [vmem:[%s71_s1 + $0x2] sm:$0x1] %v23_v5  ;;  %39 = vst [vmem:[%s71_s1 + $0x3] sm:$0x1] %v29_v6 }

// kernel: tile.13
= control target key start
LH: loop header
LB: loop body
LE: loop exit
PB: predicated region body
PF: predicated region fallthrough
CT: control target
= control target key end

     0   :  { %2 = vsyncpa [#allocation1], 0  ;;  %s44_s6 = smov [#allocation0]   ;;  %s70_s0 = inlined_call_operand.hbm [shape: f32[64], index: 0, kind: input, shape index: {}]   ;;  %s71_s1 = inlined_call_operand.vmem [shape: f32[8,64], index: 1, kind: output, shape index: {}]  }
   0x1   :  { %s9_s7 = sshll.u32 %s44_s6, 4  ;;  %s20_s10 = scalar_lea.hbm %s70_s0, 16  ;;  %s10_s7 = int_to_ptr.vmem [resolvable:$true] %s9_s7 }
   0x2   :  { %p21_p0 = scmp.ne.s32.totalorder %s70_s0, %s20_s10  ;;  %p24_p1 = scmp.lt.u32.totalorder %s20_s10, %s70_s0 }
   0x4   :  { %p26_p2 = pnand %p24_p1, %p21_p0 }
   0x6   :  { %29 = shalt.err (!%p26_p2)
}
   0x7   :  { %s30_s15 = scalar_lea.vmem %s10_s7, 16  ;;  %s34_s16 = scalar_lea.vmem %s10_s7, 32 }
   0x8   :  { %p31_p3 = scmp.ne.s32.totalorder %s10_s7, %s30_s15  ;;  %p35_p4 = scmp.lt.s32.totalorder %s10_s7, %s10_s7 }
   0x9   :  { %p36_p5 = scmp.lt.s32.totalorder %s34_s16, %s30_s15 }
   0xb   :  { %p37_p6 = por %p36_p5, %p35_p4 }
   0xd   :  { %p38_p7 = pnand %p37_p6, %p31_p3 }
   0xf   :  { %41 = shalt.err (!%p38_p7)
}
  0x10   :  { %12 = dma.hbm_to_vmem [thread:$0]  %s70_s0, 16, %s10_s7, [#allocation1]  }
  0x11   :  { %42 = dma.done.wait [#allocation1], 16  }
  0x12   :  { %43 = vsyncadd [#allocation1], 4294967280  ;;  %v16_v0 = vld [vmem:[#allocation0] ss:$0 sm:$0xff] }
  0x13   :  { %17 = vst [vmem:[%s71_s1] sm:$0xff] %v16_v0 }
  0x14   :  { %18 = vsyncpa [#allocation1], 1 }

// kernel: model_forward.1
= control target key start
LH: loop header
LB: loop body
LE: loop exit
PB: predicated region body
PF: predicated region fallthrough
CT: control target
= control target key end

     0   :  { %s3052_s15 = smov 0   ;;  %s3054_s16 = smov 0   ;;  %s4272_s0 = inlined_call_operand.vmem [shape: f32[2,9,9,9,32], index: 0, kind: input, shape index: {}]   ;;  %s4273_s1 = inlined_call_operand.vmem [shape: bf16[256,512], index: 1, kind: input, shape index: {}]   ;;  %s4274_s2 = inlined_call_operand.vmem [shape: f32[1,512], index: 2, kind: input, shape index: {}]   ;;  %s4275_s3 = inlined_call_operand.vmem [shape: f32[1,512], index: 3, kind: input, shape index: {}]   ;;  %s4276_s4 = inlined_call_operand.vmem [shape: f32[1024,512], index: 4, kind: output, shape index: {}]  }
   0x1   :  { %s3056_s17 = smov 0   ;;  %s3058_s18 = smov 0  }
   0x2   :  { %s3060_s19 = smov 0  }
   0x3 LB: > { %s23_s20 = sadd.s32 1, %s3014_s17  ;;  %s26_s21 = sadd.s32 1, %s3018_s18  ;;  %s3022_s19 = sphi %s3060_s19, %s14_s19   ;;  %s3018_s18 = sphi %s3058_s18, %s4280_s18   ;;  %s3014_s17 = sphi %s3056_s17, %s4279_s17   ;;  %s3010_s16 = sphi %s3054_s16, %s4278_s16   ;;  %s3006_s15 = sphi %s3052_s15, %s4277_s15  }
   0x4   : > { %p24_p0 = scmp.ge.s32.totalorder %s23_s20, 2  ;;  %p2455_p1 = scmp.ge.s32.totalorder %s3022_s19, 1 }
   0x5   : > { %p178_p2 = scmp.lt.s32.totalorder %s3022_s19, 5 }
   0x6   : > { %s4282_s20 = smov (%p24_p0, %s23_s20), 0  ;;  %s4284_s21 = smov (!%p24_p0, %s26_s21), %s3018_s18 }
   0x7   : > { %p179_p3 = pnand %p2455_p1, %p178_p2  ;;  %p28_p4 = scmp.ge.s32.totalorder %s4284_s21, 2 }
   0x8   : > { %p207_p5 = scmp.lt.s32.totalorder (!%p179_p3), %s3010_s16, 1  ;;  %v2874_v0 = vld [vmem:[%s4273_s1 + $0x4] ss:$16 sps:$4 sm:$0xff] (!%p179_p3)   ;;  %v2876_v1 = vld [vmem:[%s4273_s1 + $0xc] ss:$16 sps:$4 sm:$0xff] (!%p179_p3)   ;;  %s2462_s29 = smul.u32 (!%p179_p3), 576, %s3006_s15 }
   0x9   : > { %s4286_s21 = smov (%p28_p4, %s4284_s21), 0  ;;  %182 = sbr.rel (%p179_p3) target bundleno = 516 (0x204), region = 36 }
   0xa   : > { %v2878_v2 = vld [vmem:[%s4273_s1] ss:$16 sps:$4 sm:$0xff] (!%p179_p3)   ;;  %1451 = vmatprep.subr.bf16.mxu0 (!%p179_p3), %v2874_v0  ;;  %v2879_v3 = vld [vmem:[%s4273_s1 + $0x8] ss:$16 sps:$4 sm:$0xff] (!%p179_p3)   ;;  %v2880_v4 = vld [vmem:[%s4273_s1 + $0x24] ss:$16 sps:$4 sm:$0xff] (!%p179_p3)   ;;  %1644 = vmatprep.subr.bf16.mxu1 (!%p179_p3), %v2876_v1 }
   0xb   : > { %1452 = vmatpush1.bf16.msra.mxu0 (!%p179_p3), %v2878_v2  ;;  %v2882_v5 = vld [vmem:[%s4273_s1 + $0x2c] ss:$16 sps:$4 sm:$0xff] (!%p179_p3)   ;;  %v2884_v6 = vld [vmem:[%s4273_s1 + $0x20] ss:$16 sps:$4 sm:$0xff] (!%p179_p3)   ;;  %1645 = vmatpush1.bf16.msra.mxu1 (!%p179_p3), %v2879_v3  ;;  %v2885_v7 = vld [vmem:[%s4273_s1 + $0x28] ss:$16 sps:$4 sm:$0xff] (!%p179_p3)  }
   0xc   : > { %1453 = vmatprep.subr.bf16.mxu0 (!%p179_p3), %v2880_v4  ;;  %1646 = vmatprep.subr.bf16.mxu1 (!%p179_p3), %v2882_v5  ;;  %v2886_v8 = vld [vmem:[%s4273_s1 + $0x44] ss:$16 sps:$4 sm:$0xff] (!%p179_p3)   ;;  %v2888_v9 = vld [vmem:[%s4273_s1 + $0x4c] ss:$16 sps:$4 sm:$0xff] (!%p179_p3)   ;;  %v2890_v10 = vld [vmem:[%s4273_s1 + $0x40] ss:$16 sps:$4 sm:$0xff] (!%p179_p3)  }
   0xd   : > { %v2891_v11 = vld [vmem:[%s4273_s1 + $0x48] ss:$16 sps:$4 sm:$0xff] (!%p179_p3)   ;;  %vm380_vm0 = vcmask (!%p179_p3), 1046528   ;;  %s3025_s9 = smov (!%p179_p3), 32   ;;  %s3026_s10 = smov (!%p179_p3), 96   ;;  %vm902_vm1 = vcmask (!%p179_p3), 261120  }
   0xe   : > { %vm935_vm2 = vcmask (!%p179_p3), 523264   ;;  %vm968_vm3 = vcmask (!%p179_p3), 785408  }
   0xf   : > { %1454 = vmatpush1.bf16.msra.mxu0 (!%p179_p3), %v2884_v6  ;;  %1647 = vmatpush1.bf16.msra.mxu1 (!%p179_p3), %v2885_v7 }
  0x10   : > { %s208_s24 = scalar_select %p207_p5, %s3010_s16, 1  ;;  %1455 = vmatprep.subr.bf16.mxu0 %v2886_v8  ;;  %1648 = vmatprep.subr.bf16.mxu1 %v2888_v9 }
  0x12   : > { %s2530_s8 = smul.u32 1296, %s208_s24 }
  0x13   : > { %1456 = vmatpush1.bf16.msra.mxu0 %v2890_v10  ;;  %1649 = vmatpush1.bf16.msra.mxu1 %v2891_v11 }
  0x14   : > { %s211_s24 = scalar_lea.vmem %s4272_s0, %s2530_s8 }
  0x15   : > { %s3119_s27 = scalar_lea.vmem %s211_s24, %s2462_s29  ;;  %s3024_s29 = smov 64  }
  0x16   : > { %v246_v12 = vld [vmem:[%s3119_s27 + $0xa0] sm:$0xff]  ;;  %v248_v13 = vld [vmem:[%s3119_s27 + $0xb0] sm:$0xff]  ;;  %v247_v14 = vld [vmem:[%s3119_s27 + $0xa8] sm:$0x1] }
  0x17   : > { %v2574_v15 = vpack.i.bf16 %v248_v13, %v246_v12  ;;  %v408_v16 = vrot.slane %v246_v12, 1  ;;  %v249_v17 = vld [vmem:[%s3119_s27 + $0xb8] sm:$0x1]  ;;  %v409_v18 = vrot.slane %v247_v14, 1  ;;  %v244_v19 = vld [vmem:[%s3119_s27 + $0x90] sm:$0xff]  ;;  %v411_v20 = vrot.slane %v248_v13, 1 }
  0x18   : > { %v245_v21 = vld [vmem:[%s3119_s27 + $0x98] sm:$0x1]  ;;  %v405_v22 = vrot.slane %v244_v19, 1  ;;  %v228_v23 = vld [vmem:[%s3119_s27 + $0x10] sm:$0xff]  ;;  %v230_v24 = vld [vmem:[%s3119_s27 + $0x20] sm:$0xff]  ;;  %v412_v26 = vrot.slane %v249_v17, 1 }
  0x19   : > { %2575 = vrot.lane.b32.xlu1 %v2574_v15, %s3024_s29  ;;  %v410_v25 = vsel %vm380_vm0, %v408_v16, %v409_v18  ;;  %v406_v27 = vrot.slane %v245_v21, 1  ;;  %v2579_v28 = vpack.i.bf16 %v230_v24, %v228_v23  ;;  %v3141_v29 = vld [vmem:[%s3119_s27] sm:$0xff]  ;;  %v227_v30 = vld [vmem:[%s3119_s27 + $0x8] sm:$0x1]  ;;  %v232_v31 = vld [vmem:[%s3119_s27 + $0x30] sm:$0xff]  ;;  %v387_v32 = vrot.slane %v230_v24, 1 }
  0x1a   : > { %v384_v33 = vrot.slane %v228_v23, 1  ;;  %v229_v34 = vld [vmem:[%s3119_s27 + $0x18] sm:$0x1]  ;;  %v381_v35 = vrot.slane %v3141_v29, 1  ;;  %v382_v36 = vrot.slane %v227_v30, 1  ;;  %v390_v41 = vrot.slane %v232_v31, 1 }
  0x1b   : > { %v407_v37 = vsel %vm380_vm0, %v405_v22, %v406_v27  ;;  %v385_v38 = vrot.slane %v229_v34, 1  ;;  %v231_v39 = vld [vmem:[%s3119_s27 + $0x28] sm:$0x1]  ;;  %v233_v40 = vld [vmem:[%s3119_s27 + $0x38] sm:$0x1]  ;;  %v250_v46 = vld [vmem:[%s3119_s27 + $0xc0] sm:$0xff]  ;;  %v413_v52 = vsel %vm380_vm0, %v411_v20, %v412_v26 }
  0x1c   : > { %v2584_v42 = vpack.i.bf16 %v410_v25, %v407_v37  ;;  %v383_v43 = vsel %vm380_vm0, %v381_v35, %v382_v36  ;;  %v388_v44 = vrot.slane %v231_v39, 1  ;;  %v391_v45 = vrot.slane %v233_v40, 1  ;;  %v251_v47 = vld [vmem:[%s3119_s27 + $0xc8] sm:$0x1]  ;;  %v234_v56 = vld [vmem:[%s3119_s27 + $0x40] sm:$0xff]  ;;  %v236_v63 = vld [vmem:[%s3119_s27 + $0x50] sm:$0xff] }
  0x1d   : > { %2580 = vrot.lane.b32.xlu1 %v2579_v28, %s3024_s29  ;;  %v386_v48 = vsel %vm380_vm0, %v384_v33, %v385_v38  ;;  %v414_v54 = vrot.slane %v250_v46, 1  ;;  %v415_v55 = vrot.slane %v251_v47, 1  ;;  %v235_v57 = vld [vmem:[%s3119_s27 + $0x48] sm:$0x1]  ;;  %v2594_v59 = vpack.i.bf16 %v413_v52, %v410_v25  ;;  %v237_v0 = vld [vmem:[%s3119_s27 + $0x58] sm:$0x1] }
  0x1e   : > { %2585 = vrot.lane.b32.xlu0 %v2584_v42, %s3025_s9  ;;  %v2589_v49 = vpack.i.bf16 %v386_v48, %v383_v43  ;;  %v389_v50 = vsel %vm380_vm0, %v387_v32, %v388_v44  ;;  %v392_v51 = vsel %vm380_vm0, %v390_v41, %v391_v45  ;;  %v393_v60 = vrot.slane %v234_v56, 1  ;;  %v252_v1 = vld [vmem:[%s3119_s27 + $0xd0] sm:$0xff]  ;;  %v253_v2 = vld [vmem:[%s3119_s27 + $0xd8] sm:$0x1]  ;;  %v3172_v10 = vld [vmem:[%s3119_s27 + $0xe0] sm:$0xff] }
  0x1f   : > { %v2599_v53 = vpack.i.bf16 %v389_v50, %v386_v48  ;;  %v2614_v58 = vpack.i.bf16 %v392_v51, %v389_v50  ;;  %v394_v61 = vrot.slane %v235_v57, 1  ;;  %v416_v62 = vsel %vm380_vm0, %v414_v54, %v415_v55  ;;  %v255_v11 = vld [vmem:[%s3119_s27 + $0xe8] sm:$0x1]  ;;  %v238_v18 = vld [vmem:[%s3119_s27 + $0x60] sm:$0xff]  ;;  %v2894_v22 = vld [vmem:[%s4273_s1 + $0x6c] ss:$16 sps:$4 sm:$0xff]  }
  0x20   : > { %v2619_v3 = vpack.i.bf16 %v234_v56, %v232_v31  ;;  %v2604_v4 = vpack.i.bf16 %v416_v62, %v413_v52  ;;  %v396_v6 = vrot.slane %v236_v63, 1  ;;  %v397_v7 = vrot.slane %v237_v0, 1  ;;  %v239_v19 = vld [vmem:[%s3119_s27 + $0x68] sm:$0x1]  ;;  %v2892_v20 = vld [vmem:[%s4273_s1 + $0x64] ss:$16 sps:$4 sm:$0xff]   ;;  %1650 = vmatprep.subr.bf16.mxu1 %v2894_v22 }
  0x21   : > { %2600 = vrot.lane.b32.xlu1 %v2599_v53, %s3026_s10  ;;  %v395_v5 = vsel %vm380_vm0, %v393_v60, %v394_v61  ;;  %v417_v8 = vrot.slane %v252_v1, 1  ;;  %v418_v9 = vrot.slane %v253_v2, 1  ;;  %v2609_v13 = vpack.i.bf16 %v252_v1, %v250_v46  ;;  %1457 = vmatprep.subr.bf16.mxu0 %v2892_v20  ;;  %v2896_v26 = vld [vmem:[%s4273_s1 + $0x60] ss:$16 sps:$4 sm:$0xff]   ;;  %v241_v30 = vld [vmem:[%s3119_s27 + $0x78] sm:$0x1] }
  0x22   : > { %2590 = vrot.lane.b32.xlu0 %v2589_v49, %s3025_s9  ;;  %v2629_v12 = vpack.i.bf16 %v395_v5, %v392_v51  ;;  %v398_v14 = vsel %vm380_vm0, %v396_v6, %v397_v7  ;;  %v420_v16 = vrot.slane %v3172_v10, 1  ;;  %v421_v17 = vrot.slane %v255_v11, 1  ;;  %v3197_v28 = vld [vmem:[%s3119_s27 + $0x70] sm:$0xff]  ;;  %v2897_v31 = vld [vmem:[%s4273_s1 + $0x68] ss:$16 sps:$4 sm:$0xff]   ;;  %1458 = vmatpush1.bf16.msra.mxu0 %v2896_v26  ;;  %v3220_v44 = vld [vmem:[%s3119_s27 + $0x100] sm:$0xff] }
  0x23   : > { %v419_v15 = vsel %vm380_vm0, %v417_v8, %v418_v9  ;;  %v2639_v21 = vpack.i.bf16 %v398_v14, %v395_v5  ;;  %v399_v24 = vrot.slane %v238_v18, 1  ;;  %v400_v25 = vrot.slane %v239_v19, 1  ;;  %v256_v32 = vld [vmem:[%s3119_s27 + $0xf0] sm:$0xff]  ;;  %v257_v33 = vld [vmem:[%s3119_s27 + $0xf8] sm:$0x1]  ;;  %1651 = vmatpush1.bf16.msra.mxu1 %v2897_v31  ;;  %v242_v48 = vld [vmem:[%s3119_s27 + $0x80] sm:$0xff] }
  0x24   : > { %v2624_v23 = vpack.i.bf16 %v419_v15, %v416_v62  ;;  %v3194_v27 = vsel %vm380_vm0, %v420_v16, %v421_v17  ;;  %v2649_v34 = vpack.i.bf16 %v238_v18, %v236_v63  ;;  %v2898_v35 = vld [vmem:[%s4273_s1 + $0x84] ss:$16 sps:$4 sm:$0xff]   ;;  %v402_v38 = vrot.slane %v3197_v28, 1  ;;  %v2900_v40 = vld [vmem:[%s4273_s1 + $0x8c] ss:$16 sps:$4 sm:$0xff]  }
  0x25   : > { %2615 = vrot.lane.b32.xlu1 %v2614_v58, %s3025_s9  ;;  %v2634_v36 = vpack.i.bf16 %v3194_v27, %v419_v15  ;;  %v401_v37 = vsel %vm380_vm0, %v399_v24, %v400_v25  ;;  %v403_v39 = vrot.slane %v241_v30, 1  ;;  %v423_v41 = vrot.slane %v256_v32, 1  ;;  %1459 = vmatprep.subr.bf16.mxu0 %v2898_v35  ;;  %v2902_v43 = vld [vmem:[%s4273_s1 + $0x80] ss:$16 sps:$4 sm:$0xff]   ;;  %v259_v45 = vld [vmem:[%s3119_s27 + $0x108] sm:$0x1] }
  0x26   : > { %2595 = vrot.lane.b32.xlu0 %v2594_v59, %s3026_s10  ;;  %v424_v42 = vrot.slane %v257_v33, 1  ;;  %1652 = vmatprep.subr.bf16.mxu1 %v2900_v40  ;;  %v2903_v46 = vld [vmem:[%s4273_s1 + $0x88] ss:$16 sps:$4 sm:$0xff]   ;;  %v2659_v47 = vpack.i.bf16 %v401_v37, %v398_v14  ;;  %v2904_v49 = vld [vmem:[%s4273_s1 + $0xa4] ss:$16 sps:$4 sm:$0xff]   ;;  %v2644_v50 = vpack.i.bf16 %v256_v32, %v3172_v10  ;;  %v426_v55 = vrot.slane %v3220_v44, 1 }
  0x27   : > { %1460 = vmatpush1.bf16.msra.mxu0 %v2902_v43  ;;  %v3234_v51 = vsel %vm380_vm0, %v402_v38, %v403_v39  ;;  %1653 = vmatpush1.bf16.msra.mxu1 %v2903_v46  ;;  %v2906_v52 = vld [vmem:[%s4273_s1 + $0xac] ss:$16 sps:$4 sm:$0xff]   ;;  %v2908_v53 = vld [vmem:[%s4273_s1 + $0xa0] ss:$16 sps:$4 sm:$0xff]   ;;  %v427_v56 = vrot.slane %v259_v45, 1  ;;  %v677_v63 = vrot.slane %v242_v48, 1  ;;  %v2679_v9 = vpack.i.bf16 %v242_v48, %v3197_v28 }
  0x28   : > { %v425_v54 = vsel %vm380_vm0, %v423_v41, %v424_v42  ;;  %v243_v57 = vld [vmem:[%s3119_s27 + $0x88] sm:$0x1]  ;;  %1461 = vmatprep.subr.bf16.mxu0 %v2904_v49  ;;  %1654 = vmatprep.subr.bf16.mxu1 %v2906_v52  ;;  %v2910_v59 = vld [vmem:[%s4273_s1 + $0xc4] ss:$16 sps:$4 sm:$0xff]   ;;  %v2669_v60 = vpack.i.bf16 %v3234_v51, %v401_v37  ;;  %v2912_v61 = vld [vmem:[%s4273_s1 + $0xcc] ss:$16 sps:$4 sm:$0xff]  }
  0x29   : > { %2620 = vrot.lane.b32.xlu1 %v2619_v3, %s3024_s29  ;;  %v2909_v58 = vld [vmem:[%s4273_s1 + $0xa8] ss:$16 sps:$4 sm:$0xff]   ;;  %v2654_v62 = vpack.i.bf16 %v425_v54, %v3194_v27  ;;  %v260_v0 = vld [vmem:[%s3119_s27 + $0x110] sm:$0xff]  ;;  %v678_v1 = vrot.slane %v243_v57, 1  ;;  %v3270_v6 = vld [vmem:[%s3119_s27 + $0x120] sm:$0xff] }
  0x2a   : > { %2605 = vrot.lane.b32.xlu0 %v2604_v4, %s3025_s9  ;;  %v2914_v2 = vld [vmem:[%s4273_s1 + $0xc0] ss:$16 sps:$4 sm:$0xff]   ;;  %v2915_v3 = vld [vmem:[%s4273_s1 + $0xc8] ss:$16 sps:$4 sm:$0xff]   ;;  %v3266_v4 = vsel %vm380_vm0, %v426_v55, %v427_v56  ;;  %v2916_v8 = vld [vmem:[%s4273_s1 + $0xe4] ss:$16 sps:$4 sm:$0xff]   ;;  %v2674_v33 = vpack.i.bf16 %v260_v0, %v3220_v44 }
  0x2b   : > { %1462 = vmatpush1.bf16.msra.mxu0 %v2908_v53  ;;  %1655 = vmatpush1.bf16.msra.mxu1 %v2909_v58  ;;  %v261_v5 = vld [vmem:[%s3119_s27 + $0x118] sm:$0x1]  ;;  %v263_v7 = vld [vmem:[%s3119_s27 + $0x128] sm:$0x1]  ;;  %v3279_v10 = vld [vmem:[%s3119_s27 + $0x150] sm:$0xff]  ;;  %v679_v14 = vsel %vm380_vm0, %v677_v63, %v678_v1  ;;  %v680_v19 = vrot.slane %v260_v0, 1 }
  0x2c   : > { %1463 = vmatprep.subr.bf16.mxu0 %v2910_v59  ;;  %1656 = vmatprep.subr.bf16.mxu1 %v2912_v61  ;;  %v2918_v11 = vld [vmem:[%s4273_s1 + $0xec] ss:$16 sps:$4 sm:$0xff]   ;;  %v3291_v15 = vld [vmem:[%s3119_s27 + $0x130] sm:$0xff]  ;;  %v265_v16 = vld [vmem:[%s3119_s27 + $0x138] sm:$0x1]  ;;  %v681_v20 = vrot.slane %v261_v5, 1  ;;  %v2689_v25 = vpack.i.bf16 %v679_v14, %v3234_v51 }
  0x2d   : > { %2630 = vrot.lane.b32.xlu1 %v2629_v12, %s3026_s10  ;;  %v2920_v12 = vld [vmem:[%s4273_s1 + $0xe0] ss:$16 sps:$4 sm:$0xff]   ;;  %v269_v17 = vld [vmem:[%s3119_s27 + $0x158] sm:$0x1]  ;;  %v2922_v22 = vld [vmem:[%s4273_s1 + $0x104] ss:$16 sps:$4 sm:$0xff]  }
  0x2e   : > { %2610 = vrot.lane.b32.xlu0 %v2609_v13, %s3024_s29  ;;  %v2664_v13 = vpack.i.bf16 %v3266_v4, %v425_v54  ;;  %v2921_v18 = vld [vmem:[%s4273_s1 + $0xe8] ss:$16 sps:$4 sm:$0xff]   ;;  %v2924_v24 = vld [vmem:[%s4273_s1 + $0x10c] ss:$16 sps:$4 sm:$0xff]   ;;  %v429_v26 = vrot.slane %v3270_v6, 1  ;;  %v430_v27 = vrot.slane %v263_v7, 1  ;;  %v682_v37 = vsel %vm380_vm0, %v680_v19, %v681_v20 }
  0x2f   : > { %1464 = vmatpush1.bf16.msra.mxu0 %v2914_v2  ;;  %1657 = vmatpush1.bf16.msra.mxu1 %v2915_v3  ;;  %v438_v28 = vrot.slane %v3279_v10, 1  ;;  %v3313_v30 = vld [vmem:[%s3119_s27 + $0x160] sm:$0xff]  ;;  %v271_v31 = vld [vmem:[%s3119_s27 + $0x168] sm:$0x1]  ;;  %v432_v38 = vrot.slane %v3291_v15, 1  ;;  %v433_v39 = vrot.slane %v265_v16, 1  ;;  %v2684_v46 = vpack.i.bf16 %v682_v37, %v3266_v4 }
  0x30   : > { %1465 = vmatprep.subr.bf16.mxu0 %v2916_v8  ;;  %1658 = vmatprep.subr.bf16.mxu1 %v2918_v11  ;;  %v2926_v32 = vld [vmem:[%s4273_s1 + $0x100] ss:$16 sps:$4 sm:$0xff]   ;;  %v2927_v35 = vld [vmem:[%s4273_s1 + $0x108] ss:$16 sps:$4 sm:$0xff]   ;;  %v2930_v40 = vld [vmem:[%s4273_s1 + $0x12c] ss:$16 sps:$4 sm:$0xff]   ;;  %v431_v51 = vsel %vm380_vm0, %v429_v26, %v430_v27 }
  0x31   : > { %2640 = vrot.lane.b32.xlu1 %v2639_v21, %s3025_s9  ;;  %v3299_v21 = vld [vmem:[%s3119_s27 + $0x140] sm:$0xff]  ;;  %v441_v48 = vrot.slane %v3313_v30, 1  ;;  %v442_v49 = vrot.slane %v271_v31, 1  ;;  %v434_v52 = vsel %vm380_vm0, %v432_v38, %v433_v39  ;;  %v2936_v54 = vld [vmem:[%s4273_s1 + $0x14c] ss:$16 sps:$4 sm:$0xff]   ;;  %v3357_v57 = vld [vmem:[%s3119_s27 + $0x170] sm:$0xff] }
  0x32   : > { %2625 = vrot.lane.b32.xlu0 %v2624_v23, %s3026_s10  ;;  %v267_v23 = vld [vmem:[%s3119_s27 + $0x148] sm:$0x1]  ;;  %v435_v41 = vrot.slane %v3299_v21, 1  ;;  %v2699_v43 = vpack.i.bf16 %v3299_v21, %v3291_v15  ;;  %v2932_v45 = vld [vmem:[%s4273_s1 + $0x120] ss:$16 sps:$4 sm:$0xff]   ;;  %v2694_v59 = vpack.i.bf16 %v434_v52, %v431_v51 }
  0x33   : > { %1466 = vmatpush1.bf16.msra.mxu0 %v2920_v12  ;;  %1659 = vmatpush1.bf16.msra.mxu1 %v2921_v18  ;;  %v436_v42 = vrot.slane %v267_v23, 1  ;;  %v2934_v53 = vld [vmem:[%s4273_s1 + $0x144] ss:$16 sps:$4 sm:$0xff]   ;;  %v2938_v58 = vld [vmem:[%s4273_s1 + $0x140] ss:$16 sps:$4 sm:$0xff]   ;;  %v444_v12 = vrot.slane %v3357_v57, 1 }
  0x34   : > { %1467 = vmatprep.subr.bf16.mxu0 %v2922_v22  ;;  %1660 = vmatprep.subr.bf16.mxu1 %v2924_v24  ;;  %v273_v61 = vld [vmem:[%s3119_s27 + $0x178] sm:$0x1]  ;;  %v2940_v1 = vld [vmem:[%s4273_s1 + $0x164] ss:$16 sps:$4 sm:$0xff]   ;;  %v2942_v2 = vld [vmem:[%s4273_s1 + $0x16c] ss:$16 sps:$4 sm:$0xff]  }
  0x35   : > { %2650 = vrot.lane.b32.xlu1 %v2649_v34, %s3024_s29  ;;  %v439_v34 = vrot.slane %v269_v17, 1  ;;  %v437_v55 = vsel %vm380_vm0, %v435_v41, %v436_v42  ;;  %v2939_v63 = vld [vmem:[%s4273_s1 + $0x148] ss:$16 sps:$4 sm:$0xff]   ;;  %v3381_v3 = vld [vmem:[%s3119_s27 + $0x180] sm:$0xff]  ;;  %v445_v17 = vrot.slane %v273_v61, 1  ;;  %v3458_v51 = vld [vmem:[%s3119_s27 + $0x1d0] sm:$0xff] }
  0x36   : > { %2635 = vrot.lane.b32.xlu0 %v2634_v36, %s3025_s9  ;;  %v2928_v36 = vld [vmem:[%s4273_s1 + $0x124] ss:$16 sps:$4 sm:$0xff]   ;;  %v277_v0 = vld [vmem:[%s3119_s27 + $0x198] sm:$0x1]  ;;  %v275_v4 = vld [vmem:[%s3119_s27 + $0x188] sm:$0x1]  ;;  %v2704_v11 = vpack.i.bf16 %v437_v55, %v434_v52  ;;  %v2729_v23 = vpack.i.bf16 %v3381_v3, %v3357_v57 }
  0x37   : > { %1468 = vmatpush1.bf16.msra.mxu0 %v2926_v32  ;;  %1661 = vmatpush1.bf16.msra.mxu1 %v2927_v35  ;;  %v3387_v7 = vld [vmem:[%s3119_s27 + $0x1a0] sm:$0xff]  ;;  %v279_v8 = vld [vmem:[%s3119_s27 + $0x1a8] sm:$0x1]  ;;  %v451_v14 = vrot.slane %v277_v0, 1  ;;  %v2948_v19 = vld [vmem:[%s4273_s1 + $0x18c] ss:$16 sps:$4 sm:$0xff]  }
  0x38   : > { %1469 = vmatprep.subr.bf16.mxu0 %v2928_v36  ;;  %1662 = vmatprep.subr.bf16.mxu1 %v2930_v40  ;;  %v2945_v16 = vld [vmem:[%s4273_s1 + $0x168] ss:$16 sps:$4 sm:$0xff]   ;;  %v2946_v18 = vld [vmem:[%s4273_s1 + $0x184] ss:$16 sps:$4 sm:$0xff]   ;;  %v447_v20 = vrot.slane %v3381_v3, 1  ;;  %v448_v22 = vrot.slane %v275_v4, 1 }
  0x39   : > { %2660 = vrot.lane.b32.xlu1 %v2659_v47, %s3026_s10  ;;  %v440_v47 = vsel %vm380_vm0, %v438_v28, %v439_v34  ;;  %v2950_v24 = vld [vmem:[%s4273_s1 + $0x180] ss:$16 sps:$4 sm:$0xff]   ;;  %v683_v27 = vrot.slane %v3387_v7, 1  ;;  %v684_v28 = vrot.slane %v279_v8, 1  ;;  %v2951_v31 = vld [vmem:[%s4273_s1 + $0x188] ss:$16 sps:$4 sm:$0xff]  }
  0x3a   : > { %2645 = vrot.lane.b32.xlu0 %v2644_v50, %s3024_s29  ;;  %v2933_v50 = vld [vmem:[%s4273_s1 + $0x128] ss:$16 sps:$4 sm:$0xff]   ;;  %v2709_v56 = vpack.i.bf16 %v440_v47, %v437_v55  ;;  %v2952_v32 = vld [vmem:[%s4273_s1 + $0x1a4] ss:$16 sps:$4 sm:$0xff]   ;;  %v2954_v35 = vld [vmem:[%s4273_s1 + $0x1ac] ss:$16 sps:$4 sm:$0xff]   ;;  %v449_v36 = vsel %vm380_vm0, %v447_v20, %v448_v22 }
  0x3b   : > { %1470 = vmatpush1.bf16.msra.mxu0 %v2932_v45  ;;  %1663 = vmatpush1.bf16.msra.mxu1 %v2933_v50  ;;  %v3425_v34 = vld [vmem:[%s3119_s27 + $0x1b0] sm:$0xff]  ;;  %v281_v37 = vld [vmem:[%s3119_s27 + $0x1b8] sm:$0x1]  ;;  %v3433_v38 = vld [vmem:[%s3119_s27 + $0x1c0] sm:$0xff] }
  0x3c   : > { %1471 = vmatprep.subr.bf16.mxu0 %v2934_v53  ;;  %1664 = vmatprep.subr.bf16.mxu1 %v2936_v54  ;;  %v283_v40 = vld [vmem:[%s3119_s27 + $0x1c8] sm:$0x1]  ;;  %v3438_v41 = vld [vmem:[%s3119_s27 + $0x1e0] sm:$0xff]  ;;  %v453_v50 = vrot.slane %v3425_v34, 1  ;;  %v454_v53 = vrot.slane %v281_v37, 1  ;;  %v456_v54 = vrot.slane %v3433_v38, 1 }
  0x3d   : > { %2670 = vrot.lane.b32.xlu1 %v2669_v60, %s3025_s9  ;;  %v3364_v60 = vsel %vm380_vm0, %v441_v48, %v442_v49  ;;  %v287_v42 = vld [vmem:[%s3119_s27 + $0x1e8] sm:$0x1]  ;;  %v2958_v48 = vld [vmem:[%s4273_s1 + $0x1c4] ss:$16 sps:$4 sm:$0xff]   ;;  %v2960_v49 = vld [vmem:[%s4273_s1 + $0x1cc] ss:$16 sps:$4 sm:$0xff]  }
  0x3e   : > { %2655 = vrot.lane.b32.xlu0 %v2654_v62, %s3026_s10  ;;  %v3368_v62 = vld [vmem:[%s3119_s27 + $0x190] sm:$0xff]  ;;  %v2719_v5 = vpack.i.bf16 %v3364_v60, %v440_v47  ;;  %v2957_v47 = vld [vmem:[%s4273_s1 + $0x1a8] ss:$16 sps:$4 sm:$0xff]   ;;  %v463_v61 = vrot.slane %v287_v42, 1  ;;  %v2966_v4 = vld [vmem:[%s4273_s1 + $0x1ec] ss:$16 sps:$4 sm:$0xff]  }
  0x3f   : > { %1472 = vmatpush1.bf16.msra.mxu0 %v2938_v58  ;;  %1665 = vmatpush1.bf16.msra.mxu1 %v2939_v63  ;;  %v285_v55 = vld [vmem:[%s3119_s27 + $0x1d8] sm:$0x1]  ;;  %v3469_v63 = vld [vmem:[%s3119_s27 + $0x1f0] sm:$0xff] }
  0x40   : > { %1473 = vmatprep.subr.bf16.mxu0 %v2940_v1  ;;  %1666 = vmatprep.subr.bf16.mxu1 %v2942_v2  ;;  %v2963_v0 = vld [vmem:[%s4273_s1 + $0x1c8] ss:$16 sps:$4 sm:$0xff]   ;;  %v2964_v2 = vld [vmem:[%s4273_s1 + $0x1e4] ss:$16 sps:$4 sm:$0xff]   ;;  %v460_v8 = vrot.slane %v285_v55, 1 }
  0x41   : > { %2680 = vrot.lane.b32.xlu1 %v2679_v9, %s3024_s29  ;;  %v2944_v9 = vld [vmem:[%s4273_s1 + $0x160] ss:$16 sps:$4 sm:$0xff]   ;;  %v289_v1 = vld [vmem:[%s3119_s27 + $0x1f8] sm:$0x1] }
  0x42   : > { %2665 = vrot.lane.b32.xlu0 %v2664_v13, %s3025_s9  ;;  %v450_v13 = vrot.slane %v3368_v62, 1  ;;  %v297_v42 = vld [vmem:[%s3119_s27 + $0x238] sm:$0x1] }
  0x43   : > { %1474 = vmatpush1.bf16.msra.mxu0 %v2944_v9  ;;  %1667 = vmatpush1.bf16.msra.mxu1 %v2945_v16  ;;  %v2759_v9 = vpack.i.bf16 %v3458_v51, %v3433_v38  ;;  %v466_v16 = vrot.slane %v289_v1, 1  ;;  %v301_v1 = vld [vmem:[%s3119_s27 + $0x258] sm:$0x1] }
  0x44   : > { %v452_v26 = vsel %vm380_vm0, %v450_v13, %v451_v14  ;;  %1475 = vmatprep.subr.bf16.mxu0 %v2946_v18  ;;  %1668 = vmatprep.subr.bf16.mxu1 %v2948_v19  ;;  %v465_v14 = vrot.slane %v3469_v63, 1  ;;  %v455_v18 = vsel %vm380_vm0, %v453_v50, %v454_v53  ;;  %v687_v50 = vrot.slane %v297_v42, 1  ;;  %v3577_v42 = vld [vmem:[%s3119_s27 + $0x290] sm:$0xff] }
  0x45   : > { %2690 = vrot.lane.b32.xlu1 %v2689_v25, %s3026_s10  ;;  %v2714_v25 = vpack.i.bf16 %v3313_v30, %v3279_v10  ;;  %v2739_v39 = vpack.i.bf16 %v452_v26, %v449_v36 }
  0x46   : > { %2675 = vrot.lane.b32.xlu0 %v2674_v33, %s3024_s29  ;;  %v446_v33 = vsel %vm380_vm0, %v444_v12, %v445_v17  ;;  %v2744_v12 = vpack.i.bf16 %v3387_v7, %v3368_v62  ;;  %v2969_v17 = vld [vmem:[%s4273_s1 + $0x1e8] ss:$16 sps:$4 sm:$0xff]  }
  0x47   : > { %1476 = vmatpush1.bf16.msra.mxu0 %v2950_v24  ;;  %v2724_v45 = vpack.i.bf16 %v446_v33, %v3364_v60  ;;  %1669 = vmatpush1.bf16.msra.mxu1 %v2951_v31  ;;  %v2734_v58 = vpack.i.bf16 %v449_v36, %v446_v33  ;;  %v462_v60 = vrot.slane %v3438_v41, 1  ;;  %v3503_v24 = vld [vmem:[%s3119_s27 + $0x220] sm:$0xff]  ;;  %v3512_v31 = vld [vmem:[%s3119_s27 + $0x210] sm:$0xff] }
  0x48   : > { %1477 = vmatprep.subr.bf16.mxu0 %v2952_v32  ;;  %1670 = vmatprep.subr.bf16.mxu1 %v2954_v35  ;;  %v293_v32 = vld [vmem:[%s3119_s27 + $0x218] sm:$0x1]  ;;  %v474_v35 = vrot.slane %v3503_v24, 1 }
  0x49   : > { %2700 = vrot.lane.b32.xlu1 %v2699_v43, %s3024_s29  ;;  %v2956_v43 = vld [vmem:[%s4273_s1 + $0x1a0] ss:$16 sps:$4 sm:$0xff]   ;;  %v464_v13 = vsel %vm380_vm0, %v462_v60, %v463_v61  ;;  %v305_v60 = vld [vmem:[%s3119_s27 + $0x278] sm:$0x1]  ;;  %v299_v61 = vld [vmem:[%s3119_s27 + $0x248] sm:$0x1] }
  0x4a   : > { %2685 = vrot.lane.b32.xlu0 %v2684_v46, %s3026_s10  ;;  %v685_v46 = vsel %vm380_vm0, %v683_v27, %v684_v28  ;;  %v291_v27 = vld [vmem:[%s3119_s27 + $0x208] sm:$0x1] }
  0x4b   : > { %v2749_v52 = vpack.i.bf16 %v685_v46, %v452_v26  ;;  %1478 = vmatpush1.bf16.msra.mxu0 %v2956_v43  ;;  %1671 = vmatpush1.bf16.msra.mxu1 %v2957_v47  ;;  %v3507_v26 = vld [vmem:[%s3119_s27 + $0x200] sm:$0xff]  ;;  %v471_v43 = vrot.slane %v3512_v31, 1  ;;  %v2774_v47 = vpack.i.bf16 %v3469_v63, %v3438_v41 }
  0x4c   : > { %1479 = vmatprep.subr.bf16.mxu0 %v2958_v48  ;;  %1672 = vmatprep.subr.bf16.mxu1 %v2960_v49  ;;  %v468_v37 = vrot.slane %v3507_v26, 1  ;;  %v2789_v46 = vpack.i.bf16 %v3512_v31, %v3507_v26 }
  0x4d   : > { %2710 = vrot.lane.b32.xlu1 %v2709_v56, %s3025_s9  ;;  %v2962_v56 = vld [vmem:[%s4273_s1 + $0x1c0] ss:$16 sps:$4 sm:$0xff]  }
  0x4e   : > { %2695 = vrot.lane.b32.xlu0 %v2694_v59, %s3025_s9  ;;  %v457_v59 = vrot.slane %v283_v40, 1  ;;  %v296_v40 = vld [vmem:[%s3119_s27 + $0x230] sm:$0xff] }
  0x4f   : > { %1480 = vmatpush1.bf16.msra.mxu0 %v2962_v56  ;;  %1673 = vmatpush1.bf16.msra.mxu1 %v2963_v0  ;;  %v686_v49 = vrot.slane %v296_v40, 1  ;;  %v3542_v0 = vld [vmem:[%s3119_s27 + $0x250] sm:$0xff] }
  0x50   : > { %v458_v19 = vsel %vm380_vm0, %v456_v54, %v457_v59  ;;  %1481 = vmatprep.subr.bf16.mxu0 %v2964_v2  ;;  %1674 = vmatprep.subr.bf16.mxu1 %v2966_v4  ;;  %v3537_v59 = vld [vmem:[%s3119_s27 + $0x270] sm:$0xff]  ;;  %v3547_v4 = vld [vmem:[%s3119_s27 + $0x260] sm:$0xff] }
  0x51   : > { %2720 = vrot.lane.b32.xlu1 %v2719_v5, %s3026_s10  ;;  %v459_v5 = vrot.slane %v3458_v51, 1  ;;  %v2754_v22 = vpack.i.bf16 %v458_v19, %v455_v18  ;;  %v688_v56 = vsel %vm380_vm0, %v686_v49, %v687_v50  ;;  %v307_v18 = vld [vmem:[%s3119_s27 + $0x288] sm:$0x1] }
  0x52   : > { %2705 = vrot.lane.b32.xlu0 %v2704_v11, %s3026_s10  ;;  %v2968_v11 = vld [vmem:[%s4273_s1 + $0x1e0] ss:$16 sps:$4 sm:$0xff]  }
  0x53   : > { %v461_v7 = vsel %vm380_vm0, %v459_v5, %v460_v8  ;;  %1482 = vmatpush1.bf16.msra.mxu0 %v2968_v11  ;;  %1675 = vmatpush1.bf16.msra.mxu1 %v2969_v17  ;;  %v303_v5 = vld [vmem:[%s3119_s27 + $0x268] sm:$0x1]  ;;  %v810_v11 = vrot.slane %v3537_v59, 1  ;;  %v3555_v17 = vld [vmem:[%s3119_s27 + $0x280] sm:$0xff] }
  0x54   : > { %v2769_v20 = vpack.i.bf16 %v464_v13, %v461_v7  ;;  %v2764_v33 = vpack.i.bf16 %v461_v7, %v458_v19  ;;  %v807_v19 = vrot.slane %v3547_v4, 1  ;;  %v808_v7 = vrot.slane %v303_v5, 1 }
  0x55   : > { %2730 = vrot.lane.b32.xlu1 %v2729_v23, %s3024_s29  ;;  %v467_v23 = vsel %vm380_vm0, %v465_v14, %v466_v16  ;;  %v804_v14 = vrot.slane %v3542_v0, 1  ;;  %v805_v16 = vrot.slane %v301_v1, 1  ;;  %v2834_v1 = vpack.i.bf16 %v3555_v17, %v3537_v59 }
  0x56   : > { %2715 = vrot.lane.b32.xlu0 %v2714_v25, %s3024_s29  ;;  %v295_v25 = vld [vmem:[%s3119_s27 + $0x228] sm:$0x1]  ;;  %v2779_v28 = vpack.i.bf16 %v467_v23, %v464_v13  ;;  %v802_v13 = vrot.slane %v299_v61, 1 }
  0x57   : > { %v475_v36 = vrot.slane %v295_v25, 1  ;;  %v813_v25 = vrot.slane %v3555_v17, 1 }
  0x59   : > { %2740 = vrot.lane.b32.xlu1 %v2739_v39, %s3025_s9  ;;  %v469_v39 = vrot.slane %v291_v27, 1  ;;  %v476_v48 = vsel %vm380_vm0, %v474_v35, %v475_v36  ;;  %v814_v27 = vrot.slane %v307_v18, 1 }
  0x5a   : > { %2725 = vrot.lane.b32.xlu0 %v2724_v45, %s3025_s9  ;;  %v472_v45 = vrot.slane %v293_v32, 1  ;;  %v2809_v2 = vpack.i.bf16 %v688_v56, %v476_v48  ;;  %v806_v32 = vsel %vm380_vm0, %v804_v14, %v805_v16 }
  0x5c   : > { %v473_v53 = vsel %vm380_vm0, %v471_v43, %v472_v45  ;;  %v309_v43 = vld [vmem:[%s3119_s27 + $0x298] sm:$0x1] }
  0x5d   : > { %2750 = vrot.lane.b32.xlu1 %v2749_v52, %s3026_s10  ;;  %v470_v52 = vsel %vm380_vm0, %v468_v37, %v469_v39  ;;  %v2799_v54 = vpack.i.bf16 %v476_v48, %v473_v53  ;;  %v815_v37 = vsel %vm380_vm0, %v813_v25, %v814_v27  ;;  %v3573_v39 = vld [vmem:[%s3119_s27 + $0x2b0] sm:$0xff] }
  0x5e   : > { %2735 = vrot.lane.b32.xlu0 %v2734_v58, %s3026_s10  ;;  %v2784_v55 = vpack.i.bf16 %v470_v52, %v467_v23  ;;  %v3534_v58 = vld [vmem:[%s3119_s27 + $0x240] sm:$0xff]  ;;  %v2794_v8 = vpack.i.bf16 %v473_v53, %v470_v52  ;;  %v822_v49 = vrot.slane %v3573_v39, 1  ;;  %v816_v52 = vrot.slane %v3577_v42, 1 }
  0x5f   : > { %v817_v53 = vrot.slane %v309_v43, 1 }
  0x61   : > { %2760 = vrot.lane.b32.xlu1 %v2759_v9, %s3024_s29  ;;  %v801_v9 = vrot.slane %v3534_v58, 1 }
  0x62   : > { %2745 = vrot.lane.b32.xlu0 %v2744_v12, %s3024_s29  ;;  %v811_v12 = vrot.slane %v305_v60, 1 }
  0x64   : > { %v812_v23 = vsel %vm380_vm0, %v810_v11, %v811_v12 }
  0x65   : > { %2770 = vrot.lane.b32.xlu1 %v2769_v20, %s3025_s9  ;;  %v2819_v20 = vpack.i.bf16 %v3547_v4, %v3542_v0  ;;  %v2839_v45 = vpack.i.bf16 %v815_v37, %v812_v23 }
  0x66   : > { %2755 = vrot.lane.b32.xlu0 %v2754_v22, %s3025_s9  ;;  %v2804_v22 = vpack.i.bf16 %v296_v40, %v3503_v24  ;;  %v313_v40 = vld [vmem:[%s3119_s27 + $0x2b8] sm:$0x1] }
  0x67   : > { %v823_v50 = vrot.slane %v313_v40, 1 }
  0x69   : > { %2780 = vrot.lane.b32.xlu1 %v2779_v28, %s3026_s10  ;;  %v803_v28 = vsel %vm380_vm0, %v801_v9, %v802_v13  ;;  %v818_v9 = vsel %vm380_vm0, %v816_v52, %v817_v53  ;;  %v2972_v52 = vld [vmem:[%s3119_s27 + $0x10] sm:$0xff] }
  0x6a   : > { %2765 = vrot.lane.b32.xlu0 %v2764_v33, %s3026_s10  ;;  %v809_v33 = vsel %vm380_vm0, %v807_v19, %v808_v7  ;;  %v2814_v36 = vpack.i.bf16 %v806_v32, %v803_v28  ;;  %v2844_v13 = vpack.i.bf16 %v818_v9, %v815_v37 }
  0x6b   : > { %v2829_v35 = vpack.i.bf16 %v812_v23, %v809_v33  ;;  %v2824_v48 = vpack.i.bf16 %v809_v33, %v806_v32 }
  0x6d   : > { %2790 = vrot.lane.b32.xlu1 %v2789_v46, %s3024_s29  ;;  %v3582_v46 = vld [vmem:[%s3119_s27 + $0x2a0] sm:$0xff] }
  0x6e   : > { %2775 = vrot.lane.b32.xlu0 %v2774_v47, %s3024_s29  ;;  %v311_v47 = vld [vmem:[%s3119_s27 + $0x2a8] sm:$0x1]  ;;  %v819_v56 = vrot.slane %v3582_v46, 1  ;;  %v2849_v61 = vpack.i.bf16 %v3582_v46, %v3577_v42 }
  0x6f   : > { %v820_v60 = vrot.slane %v311_v47, 1  ;;  %v2970_v47 = vld [vmem:[%s3119_s27 + $0xa0] sm:$0xff] }
  0x71   : > { %2800 = vrot.lane.b32.xlu1 %v2799_v54, %s3025_s9  ;;  %v314_v54 = vld [vmem:[%s3119_s27 + $0x2c0] sm:$0xff]  ;;  %v821_v11 = vsel %vm380_vm0, %v819_v56, %v820_v60 }
  0x72   : > { %2785 = vrot.lane.b32.xlu0 %v2784_v55, %s3025_s9  ;;  %v315_v55 = vld [vmem:[%s3119_s27 + $0x2c8] sm:$0x1]  ;;  %v875_v5 = vrot.slane %v314_v54, 1  ;;  %v2854_v18 = vpack.i.bf16 %v821_v11, %v818_v9  ;;  %v2864_v7 = vpack.i.bf16 %v314_v54, %v3573_v39 }
  0x75   : > { %2810 = vrot.lane.b32.xlu1 %v2809_v2, %s3026_s10  ;;  %v824_v2 = vsel %vm380_vm0, %v822_v49, %v823_v50  ;;  %v2971_v49 = vld [vmem:[%s3119_s27 + $0x90] sm:$0xff] }
  0x76   : > { %2795 = vrot.lane.b32.xlu0 %v2794_v8, %s3026_s10  ;;  %v876_v8 = vrot.slane %v315_v55, 1  ;;  %v2859_v12 = vpack.i.bf16 %v824_v2, %v821_v11 }
  0x78   : > { %v877_v14 = vsel %vm380_vm0, %v875_v5, %v876_v8 }
  0x79   : > { %2820 = vrot.lane.b32.xlu1 %v2819_v20, %s3024_s29  ;;  %v2869_v16 = vpack.i.bf16 %v877_v14, %v824_v2 }
  0x7a   : > { %2805 = vrot.lane.b32.xlu0 %v2804_v22, %s3024_s29 }
  0x7d   : > { %2830 = vrot.lane.b32.xlu1 %v2829_v35, %s3025_s9 }
  0x7e   : > { %2815 = vrot.lane.b32.xlu0 %v2814_v36, %s3025_s9 }
  0x81   : > { %2840 = vrot.lane.b32.xlu1 %v2839_v45, %s3026_s10 }
  0x82   : > { %2825 = vrot.lane.b32.xlu0 %v2824_v48, %s3026_s10 }
  0x85   : > { %2850 = vrot.lane.b32.xlu1 %v2849_v61, %s3024_s29 }
  0x86   : > { %2835 = vrot.lane.b32.xlu0 %v2834_v1, %s3024_s29 }
  0x89   : > { %2860 = vrot.lane.b32.xlu1 %v2859_v12, %s3025_s9 }
  0x8a   : > { %2845 = vrot.lane.b32.xlu0 %v2844_v13, %s3025_s9 }
  0x8b   : > { %v2576_v19 = vpop.permute.xlu1 %2575 }
  0x8c   : > { %v2578_v37 = vunpack.i.h.bf16 %v2576_v19  ;;  %v2577_v40 = vunpack.i.l.bf16 %v2576_v19 }
  0x8d   : > { %2870 = vrot.lane.b32.xlu1 %v2869_v16, %s3026_s10 }
  0x8e   : > { %2855 = vrot.lane.b32.xlu0 %v2854_v18, %s3026_s10 }
  0x8f   : > { %v2581_v20 = vpop.permute.xlu1 %2580 }
  0x90   : > { %v2586_v22 = vpop.permute.xlu0 %2585  ;;  %v2583_v28 = vunpack.i.h.bf16 %v2581_v20  ;;  %v2582_v32 = vunpack.i.l.bf16 %v2581_v20 }
  0x91   : > { %v2588_v23 = vunpack.i.h.bf16 %v2586_v22  ;;  %v2587_v25 = vunpack.i.l.bf16 %v2586_v22 }
  0x92   : > { %2865 = vrot.lane.b32.xlu0 %v2864_v7, %s3024_s29 }
  0x93   : > { %v2601_v27 = vpop.permute.xlu1 %2600  ;;  %v912_v48 = vsel %vm902_vm1, %v2970_v47, %v2588_v23  ;;  %v911_v50 = vsel %vm902_vm1, %v2971_v49, %v2587_v25 }
  0x94   : > { %v2591_v33 = vpop.permute.xlu0 %2590  ;;  %v2603_v43 = vunpack.i.h.bf16 %v2601_v27  ;;  %v2602_v45 = vunpack.i.l.bf16 %v2601_v27  ;;  %v944_v5 = vsel %vm935_vm2, %v911_v50, %v2577_v40  ;;  %v945_v8 = vsel %vm935_vm2, %v912_v48, %v2578_v37  ;;  %v2973_v27 = vld [vmem:[%s3119_s27 + $0x30] sm:$0xff] }
  0x95   : > { %v2593_v35 = vunpack.i.h.bf16 %v2591_v33  ;;  %v2592_v36 = vunpack.i.l.bf16 %v2591_v33 }
  0x97   : > { %v904_v53 = vsel %vm902_vm1, %v2972_v52, %v2593_v35  ;;  %v903_v54 = vsel %vm902_vm1, %v3141_v29, %v2592_v36  ;;  %v2616_v55 = vpop.permute.xlu1 %2615  ;;  %v2975_v52 = vld [vmem:[%s3119_s27 + $0xc0] sm:$0xff] }
  0x98   : > { %v2596_v56 = vpop.permute.xlu0 %2595  ;;  %v936_v60 = vsel %vm935_vm2, %v903_v54, %v2582_v32  ;;  %v937_v61 = vsel %vm935_vm2, %v904_v53, %v2583_v28  ;;  %v2618_v18 = vunpack.i.h.bf16 %v2616_v55  ;;  %v2617_v19 = vunpack.i.l.bf16 %v2616_v55  ;;  %v2974_v32 = vld [vmem:[%s3119_s27 + $0x20] sm:$0xff]  ;;  %v2976_v54 = vld [vmem:[%s3119_s27 + $0xb0] sm:$0xff] }
  0x99   : > { %v2598_v1 = vunpack.i.h.bf16 %v2596_v56  ;;  %v2597_v2 = vunpack.i.l.bf16 %v2596_v56  ;;  %v969_v9 = vsel %vm968_vm3, %v936_v60, %v2602_v45  ;;  %v970_v11 = vsel %vm968_vm3, %v937_v61, %v2603_v43 }
  0x9a   : > { %v1025_v7 = vpack.c.bf16 %v970_v11, %v969_v9  ;;  %v906_v28 = vsel %vm902_vm1, %v2973_v27, %v2618_v18  ;;  %v905_v33 = vsel %vm902_vm1, %v2974_v32, %v2617_v19  ;;  %v2978_v27 = vld [vmem:[%s3119_s27 + $0x40] sm:$0xff] }
  0x9b   : > { %v978_v12 = vsel %vm968_vm3, %v945_v8, %v2598_v1  ;;  %v977_v29 = vsel %vm968_vm3, %v944_v5, %v2597_v2  ;;  %v2621_v13 = vpop.permute.xlu1 %2620 }
  0x9c   : > { %v3625_v14 = vpack.c.bf16 %v978_v12, %v977_v29  ;;  %v2606_v16 = vpop.permute.xlu0 %2605  ;;  %v2623_v22 = vunpack.i.h.bf16 %v2621_v13  ;;  %v2622_v23 = vunpack.i.l.bf16 %v2621_v13 }
  0x9d   : > { %v2608_v35 = vunpack.i.h.bf16 %v2606_v16  ;;  %v2607_v36 = vunpack.i.l.bf16 %v2606_v16 }
  0x9e   : > { %1483 = vmatprep.mubr.bf16.mxu0 %v3625_v14  ;;  %1676 = vmatprep.mubr.bf16.mxu1 %v3625_v14  ;;  %v938_v48 = vsel %vm935_vm2, %v905_v33, %v2622_v23  ;;  %v939_v49 = vsel %vm935_vm2, %v906_v28, %v2623_v22  ;;  %v2977_v23 = vld [vmem:[%s3119_s27 + $0x50] sm:$0xff] }
  0x9f   : > { %1484 = vmatmul.mubr.bf16.vlgmr.msra.gmra.mrb[0].mxu0 %v1025_v7  ;;  %1677 = vmatmul.mubr.bf16.vlgmr.msra.gmra.mrb[0].mxu1 %v1025_v7  ;;  %v2631_v20 = vpop.permute.xlu1 %2630  ;;  %v914_v53 = vsel %vm902_vm1, %v2975_v52, %v2608_v35  ;;  %v913_v55 = vsel %vm902_vm1, %v2976_v54, %v2607_v36  ;;  %v2980_v52 = vld [vmem:[%s3119_s27 + $0xd0] sm:$0xff] }
  0xa0   : > { %v2611_v25 = vpop.permute.xlu0 %2610  ;;  %v2633_v43 = vunpack.i.h.bf16 %v2631_v20  ;;  %v2632_v45 = vunpack.i.l.bf16 %v2631_v20 }
  0xa1   : > { %v2613_v37 = vunpack.i.h.bf16 %v2611_v25  ;;  %v2612_v40 = vunpack.i.l.bf16 %v2611_v25 }
  0xa2   : > { %v971_v2 = vsel %vm968_vm3, %v938_v48, %v2632_v45  ;;  %v972_v5 = vsel %vm968_vm3, %v939_v49, %v2633_v43  ;;  %v2979_v49 = vld [vmem:[%s3119_s27 + $0xe0] sm:$0xff] }
  0xa3   : > { %v2641_v47 = vpop.permute.xlu1 %2640  ;;  %v946_v61 = vsel %vm935_vm2, %v913_v55, %v2612_v40  ;;  %v947_v1 = vsel %vm935_vm2, %v914_v53, %v2613_v37  ;;  %v1027_v18 = vpack.c.bf16 %v972_v5, %v971_v2 }
  0xa4   : > { %v2626_v50 = vpop.permute.xlu0 %2625  ;;  %v2643_v13 = vunpack.i.h.bf16 %v2641_v47  ;;  %v2642_v16 = vunpack.i.l.bf16 %v2641_v47 }
  0xa5   : > { %v2628_v56 = vunpack.i.h.bf16 %v2626_v50  ;;  %v2627_v60 = vunpack.i.l.bf16 %v2626_v50 }
  0xa6   : > { %v908_v25 = vsel %vm902_vm1, %v2977_v23, %v2643_v13  ;;  %v907_v28 = vsel %vm902_vm1, %v2978_v27, %v2642_v16 }
  0xa7   : > { %v979_v8 = vsel %vm968_vm3, %v946_v61, %v2627_v60  ;;  %v980_v9 = vsel %vm968_vm3, %v947_v1, %v2628_v56  ;;  %v2651_v11 = vpop.permute.xlu1 %2650 }
  0xa8   : > { %v3645_v12 = vpack.c.bf16 %v980_v9, %v979_v8  ;;  %v2636_v29 = vpop.permute.xlu0 %2635  ;;  %v2653_v7 = vunpack.i.h.bf16 %v2651_v11  ;;  %v2652_v20 = vunpack.i.l.bf16 %v2651_v11 }
  0xa9   : > { %v2638_v32 = vunpack.i.h.bf16 %v2636_v29  ;;  %v2637_v33 = vunpack.i.l.bf16 %v2636_v29 }
  0xaa   : > { %1493 = vmatprep.mubr.bf16.mxu0 %v3645_v12  ;;  %1686 = vmatprep.mubr.bf16.mxu1 %v3645_v12  ;;  %v940_v45 = vsel %vm935_vm2, %v907_v28, %v2652_v20  ;;  %v941_v47 = vsel %vm935_vm2, %v908_v25, %v2653_v7  ;;  %v2982_v25 = vld [vmem:[%s3119_s27 + $0x60] sm:$0xff] }
  0xab   : > { %1494 = vmatmul.mubr.bf16.gmra.mrb[4].mxu0 %v1027_v18  ;;  %1687 = vmatmul.mubr.bf16.gmra.mrb[4].mxu1 %v1027_v18  ;;  %v2661_v19 = vpop.permute.xlu1 %2660  ;;  %v916_v50 = vsel %vm902_vm1, %v2979_v49, %v2638_v32  ;;  %v915_v53 = vsel %vm902_vm1, %v2980_v52, %v2637_v33  ;;  %v2983_v49 = vld [vmem:[%s3119_s27 + $0xf0] sm:$0xff] }
  0xac   : > { %v2646_v22 = vpop.permute.xlu0 %2645  ;;  %v2663_v37 = vunpack.i.h.bf16 %v2661_v19  ;;  %v2662_v40 = vunpack.i.l.bf16 %v2661_v19 }
  0xad   : > { %v2648_v35 = vunpack.i.h.bf16 %v2646_v22  ;;  %v2647_v36 = vunpack.i.l.bf16 %v2646_v22  ;;  %v2981_v22 = vld [vmem:[%s3119_s27 + $0x70] sm:$0xff]  ;;  %s2457_s27 = sshll.u32 %s3010_s16, 1 }
  0xae   : > { %v973_v61 = vsel %vm968_vm3, %v940_v45, %v2662_v40  ;;  %v974_v1 = vsel %vm968_vm3, %v941_v47, %v2663_v37  ;;  %s213_s29 = sadd.s32 %s3006_s15, %s2457_s27 }
  0xaf   : > { %v2671_v43 = vpop.permute.xlu1 %2670  ;;  %v948_v56 = vsel %vm935_vm2, %v915_v53, %v2647_v36  ;;  %v949_v60 = vsel %vm935_vm2, %v916_v50, %v2648_v35  ;;  %v1029_v16 = vpack.c.bf16 %v974_v1, %v973_v61  ;;  %s2458_s9 = sshll.u32 %s213_s29, 5 }
  0xb0   : > { %v2656_v48 = vpop.permute.xlu0 %2655  ;;  %v2673_v29 = vunpack.i.h.bf16 %v2671_v43  ;;  %v2672_v13 = vunpack.i.l.bf16 %v2671_v43  ;;  %p215_p6 = scmp.lt.s32.totalorder %s2458_s9, 127 }
  0xb1   : > { %v2658_v54 = vunpack.i.h.bf16 %v2656_v48  ;;  %v2657_v55 = vunpack.i.l.bf16 %v2656_v48 }
  0xb2   : > { %v910_v23 = vsel %vm902_vm1, %v2981_v22, %v2673_v29  ;;  %v909_v27 = vsel %vm902_vm1, %v2982_v25, %v2672_v13  ;;  %s4288_s9 = smov (!%p215_p6, %s2458_s9), 127 }
  0xb3   : > { %v981_v2 = vsel %vm968_vm3, %v948_v56, %v2657_v55  ;;  %v982_v5 = vsel %vm968_vm3, %v949_v60, %v2658_v54  ;;  %v2681_v8 = vpop.permute.xlu1 %2680  ;;  %s2529_s15 = sshll.u32 %s4288_s9, 5 }
  0xb4   : > { %v3665_v9 = vpack.c.bf16 %v982_v5, %v981_v2  ;;  %v2666_v11 = vpop.permute.xlu0 %2665  ;;  %v2683_v19 = vunpack.i.h.bf16 %v2681_v8  ;;  %v2682_v7 = vunpack.i.l.bf16 %v2681_v8  ;;  %s3881_s14 = scalar_lea.vmem %s4276_s4, %s2529_s15 }
  0xb5   : > { %v2668_v28 = vunpack.i.h.bf16 %v2666_v11  ;;  %v2667_v32 = vunpack.i.l.bf16 %v2666_v11 }
  0xb6   : > { %1503 = vmatprep.mubr.bf16.mxu0 %v3665_v9  ;;  %1696 = vmatprep.mubr.bf16.mxu1 %v3665_v9  ;;  %v942_v43 = vsel %vm935_vm2, %v909_v27, %v2682_v7  ;;  %v943_v45 = vsel %vm935_vm2, %v910_v23, %v2683_v19 }
  0xb7   : > { %1504 = vmatmul.mubr.bf16.gmra.mrb[8].mxu0 %v1029_v16  ;;  %1697 = vmatmul.mubr.bf16.gmra.mrb[8].mxu1 %v1029_v16  ;;  %v2691_v18 = vpop.permute.xlu1 %2690  ;;  %v918_v48 = vsel %vm902_vm1, %v3220_v44, %v2668_v28  ;;  %v917_v50 = vsel %vm902_vm1, %v2983_v49, %v2667_v32 }
  0xb8   : > { %v2676_v20 = vpop.permute.xlu0 %2675  ;;  %v2693_v36 = vunpack.i.h.bf16 %v2691_v18  ;;  %v2692_v37 = vunpack.i.l.bf16 %v2691_v18 }
  0xb9   : > { %v2678_v33 = vunpack.i.h.bf16 %v2676_v20  ;;  %v2677_v35 = vunpack.i.l.bf16 %v2676_v20 }
  0xba   : > { %v975_v56 = vsel %vm968_vm3, %v942_v43, %v2692_v37  ;;  %v976_v60 = vsel %vm968_vm3, %v943_v45, %v2693_v36 }
  0xbb   : > { %v2701_v40 = vpop.permute.xlu1 %2700  ;;  %v950_v54 = vsel %vm935_vm2, %v917_v50, %v2677_v35  ;;  %v951_v55 = vsel %vm935_vm2, %v918_v48, %v2678_v33  ;;  %v1031_v29 = vpack.c.bf16 %v976_v60, %v975_v56 }
  0xbc   : > { %v2686_v47 = vpop.permute.xlu0 %2685  ;;  %v2703_v13 = vunpack.i.h.bf16 %v2701_v40  ;;  %v2702_v16 = vunpack.i.l.bf16 %v2701_v40 }
  0xbd   : > { %v2688_v52 = vunpack.i.h.bf16 %v2686_v47  ;;  %v2687_v53 = vunpack.i.l.bf16 %v2686_v47 }
  0xbf   : > { %v983_v61 = vsel %vm968_vm3, %v950_v54, %v2687_v53  ;;  %v984_v1 = vsel %vm968_vm3, %v951_v55, %v2688_v52  ;;  %v2711_v2 = vpop.permute.xlu1 %2710 }
  0xc0   : > { %v3685_v5 = vpack.c.bf16 %v984_v1, %v983_v61  ;;  %v2696_v44 = vpop.permute.xlu0 %2695  ;;  %v2713_v7 = vunpack.i.h.bf16 %v2711_v2  ;;  %v2712_v23 = vunpack.i.l.bf16 %v2711_v2 }
  0xc1   : > { %v2698_v8 = vunpack.i.h.bf16 %v2696_v44  ;;  %v2697_v11 = vunpack.i.l.bf16 %v2696_v44 }
  0xc2   : > { %1513 = vmatprep.mubr.bf16.mxu0 %v3685_v5  ;;  %1706 = vmatprep.mubr.bf16.mxu1 %v3685_v5  ;;  %v921_v37 = vsel %vm902_vm1, %v3299_v21, %v2712_v23 }
  0xc3   : > { %v920_v18 = vsel %vm902_vm1, %v3291_v15, %v2698_v8  ;;  %v919_v19 = vsel %vm902_vm1, %v3270_v6, %v2697_v11  ;;  %1514 = vmatmul.mubr.bf16.gmra.mrb[12].mxu0 %v1031_v29  ;;  %1707 = vmatmul.mubr.bf16.gmra.mrb[12].mxu1 %v1031_v29  ;;  %v2721_v20 = vpop.permute.xlu1 %2720  ;;  %v922_v15 = vsel %vm902_vm1, %v3279_v10, %v2713_v7 }
  0xc4   : > { %v2706_v22 = vpop.permute.xlu0 %2705  ;;  %v952_v28 = vsel %vm935_vm2, %v919_v19, %v2702_v16  ;;  %v953_v32 = vsel %vm935_vm2, %v920_v18, %v2703_v13  ;;  %v2723_v43 = vunpack.i.h.bf16 %v2721_v20  ;;  %v2722_v45 = vunpack.i.l.bf16 %v2721_v20 }
  0xc5   : > { %v2708_v25 = vunpack.i.h.bf16 %v2706_v22  ;;  %v2707_v27 = vunpack.i.l.bf16 %v2706_v22 }
  0xc7   : > { %v985_v33 = vsel %vm968_vm3, %v952_v28, %v2707_v27  ;;  %v986_v35 = vsel %vm968_vm3, %v953_v32, %v2708_v25  ;;  %v2731_v6 = vpop.permute.xlu1 %2730 }
  0xc8   : > { %v3699_v36 = vpack.c.bf16 %v986_v35, %v985_v33  ;;  %v2716_v40 = vpop.permute.xlu0 %2715  ;;  %v2733_v54 = vunpack.i.h.bf16 %v2731_v6  ;;  %v2732_v55 = vunpack.i.l.bf16 %v2731_v6 }
  0xc9   : > { %v2718_v47 = vunpack.i.h.bf16 %v2716_v40  ;;  %v2717_v48 = vunpack.i.l.bf16 %v2716_v40 }
  0xca   : > { %1523 = vmatprep.mubr.bf16.mxu0 %v3699_v36  ;;  %1716 = vmatprep.mubr.bf16.mxu1 %v3699_v36 }
  0xcb   : > { %v955_v49 = vsel %vm935_vm2, %v922_v15, %v2718_v47  ;;  %v954_v50 = vsel %vm935_vm2, %v921_v37, %v2717_v48  ;;  %1524 = vmatmul.mubr.bf16.gmra.mrb[16].mxu0 %v3625_v14  ;;  %1717 = vmatmul.mubr.bf16.gmra.mrb[16].mxu1 %v3625_v14  ;;  %v2741_v10 = vpop.permute.xlu1 %2740 }
  0xcc   : > { %v987_v21 = vsel %vm968_vm3, %v954_v50, %v2722_v45  ;;  %v988_v52 = vsel %vm968_vm3, %v955_v49, %v2723_v43  ;;  %v2726_v53 = vpop.permute.xlu0 %2725  ;;  %v2743_v14 = vunpack.i.h.bf16 %v2741_v10  ;;  %v2742_v13 = vunpack.i.l.bf16 %v2741_v10 }
  0xcd   : > { %v3711_v56 = vpack.c.bf16 %v988_v52, %v987_v21  ;;  %v2728_v60 = vunpack.i.h.bf16 %v2726_v53  ;;  %v2727_v61 = vunpack.i.l.bf16 %v2726_v53 }
  0xce   : > { %v925_v22 = vsel %vm902_vm1, %v3381_v3, %v2742_v13 }
  0xcf   : > { %v924_v1 = vsel %vm902_vm1, %v3357_v57, %v2728_v60  ;;  %v923_v2 = vsel %vm902_vm1, %v3313_v30, %v2727_v61  ;;  %1533 = vmatprep.mubr.bf16.mxu0 %v3711_v56  ;;  %1726 = vmatprep.mubr.bf16.mxu1 %v3711_v56  ;;  %v2751_v44 = vpop.permute.xlu1 %2750  ;;  %v926_v30 = vsel %vm902_vm1, %v3368_v62, %v2743_v14 }
  0xd0   : > { %v956_v8 = vsel %vm935_vm2, %v923_v2, %v2732_v55  ;;  %v957_v11 = vsel %vm935_vm2, %v924_v1, %v2733_v54  ;;  %v2736_v29 = vpop.permute.xlu0 %2735  ;;  %v2753_v25 = vunpack.i.h.bf16 %v2751_v44  ;;  %v2752_v27 = vunpack.i.l.bf16 %v2751_v44 }
  0xd1   : > { %v2738_v16 = vunpack.i.h.bf16 %v2736_v29  ;;  %v2737_v18 = vunpack.i.l.bf16 %v2736_v29 }
  0xd3   : > { %v989_v19 = vsel %vm968_vm3, %v956_v8, %v2737_v18  ;;  %v990_v57 = vsel %vm968_vm3, %v957_v11, %v2738_v16  ;;  %1534 = vmatmul.mubr.bf16.gmra.mrb[20].mxu0 %v3645_v12  ;;  %1727 = vmatmul.mubr.bf16.gmra.mrb[20].mxu1 %v3645_v12  ;;  %v2761_v7 = vpop.permute.xlu1 %2760 }
  0xd4   : > { %v3727_v20 = vpack.c.bf16 %v990_v57, %v989_v19  ;;  %v2746_v23 = vpop.permute.xlu0 %2745  ;;  %v2763_v6 = vunpack.i.h.bf16 %v2761_v7  ;;  %v2762_v3 = vunpack.i.l.bf16 %v2761_v7 }
  0xd5   : > { %v2748_v28 = vunpack.i.h.bf16 %v2746_v23  ;;  %v2747_v32 = vunpack.i.l.bf16 %v2746_v23 }
  0xd6   : > { %1543 = vmatprep.mubr.bf16.mxu0 %v3727_v20  ;;  %1736 = vmatprep.mubr.bf16.mxu1 %v3727_v20 }
  0xd7   : > { %v959_v12 = vsel %vm935_vm2, %v926_v30, %v2748_v28  ;;  %v958_v33 = vsel %vm935_vm2, %v925_v22, %v2747_v32  ;;  %v2771_v37 = vpop.permute.xlu1 %2770 }
  0xd8   : > { %v991_v62 = vsel %vm968_vm3, %v958_v33, %v2752_v27  ;;  %v992_v35 = vsel %vm968_vm3, %v959_v12, %v2753_v25  ;;  %v2756_v15 = vpop.permute.xlu0 %2755  ;;  %v2773_v21 = vunpack.i.h.bf16 %v2771_v37  ;;  %v2772_v52 = vunpack.i.l.bf16 %v2771_v37 }
  0xd9   : > { %v3737_v40 = vpack.c.bf16 %v992_v35, %v991_v62  ;;  %v2758_v43 = vunpack.i.h.bf16 %v2756_v15  ;;  %v2757_v45 = vunpack.i.l.bf16 %v2756_v15 }
  0xda   : > { %v929_v61 = vsel %vm902_vm1, %v3458_v51, %v2772_v52 }
  0xdb   : > { %1544 = vmatmul.mubr.bf16.gmra.mrb[24].mxu0 %v3665_v9  ;;  %1737 = vmatmul.mubr.bf16.gmra.mrb[24].mxu1 %v3665_v9  ;;  %v928_v47 = vsel %vm902_vm1, %v3433_v38, %v2758_v43  ;;  %v927_v48 = vsel %vm902_vm1, %v3425_v34, %v2757_v45  ;;  %v2781_v9 = vpop.permute.xlu1 %2780  ;;  %v930_v34 = vsel %vm902_vm1, %v3438_v41, %v2773_v21 }
  0xdc   : > { %1553 = vmatprep.mubr.bf16.mxu0 %v3737_v40  ;;  %1746 = vmatprep.mubr.bf16.mxu1 %v3737_v40  ;;  %v960_v49 = vsel %vm935_vm2, %v927_v48, %v2762_v3  ;;  %v961_v50 = vsel %vm935_vm2, %v928_v47, %v2763_v6  ;;  %v2766_v10 = vpop.permute.xlu0 %2765  ;;  %v2783_v44 = vunpack.i.h.bf16 %v2781_v9  ;;  %v2782_v8 = vunpack.i.l.bf16 %v2781_v9 }
  0xdd   : > { %v2768_v53 = vunpack.i.h.bf16 %v2766_v10  ;;  %v2767_v54 = vunpack.i.l.bf16 %v2766_v10 }
  0xdf   : > { %v993_v55 = vsel %vm968_vm3, %v960_v49, %v2767_v54  ;;  %v994_v38 = vsel %vm968_vm3, %v961_v50, %v2768_v53  ;;  %v2791_v11 = vpop.permute.xlu1 %2790 }
  0xe0   : > { %v3751_v60 = vpack.c.bf16 %v994_v38, %v993_v55  ;;  %v2776_v1 = vpop.permute.xlu0 %2775  ;;  %v2793_v57 = vunpack.i.h.bf16 %v2791_v11  ;;  %v2792_v30 = vunpack.i.l.bf16 %v2791_v11 }
  0xe1   : > { %v2778_v2 = vunpack.i.h.bf16 %v2776_v1  ;;  %v2777_v14 = vunpack.i.l.bf16 %v2776_v1 }
  0xe3   : > { %1554 = vmatmul.mubr.bf16.gmra.mrb[28].mxu0 %v3685_v5  ;;  %1747 = vmatmul.mubr.bf16.gmra.mrb[28].mxu1 %v3685_v5  ;;  %v963_v29 = vsel %vm935_vm2, %v930_v34, %v2778_v2  ;;  %v962_v13 = vsel %vm935_vm2, %v929_v61, %v2777_v14  ;;  %v2801_v25 = vpop.permute.xlu1 %2800 }
  0xe4   : > { %1563 = vmatprep.mubr.bf16.mxu0 %v3751_v60  ;;  %1756 = vmatprep.mubr.bf16.mxu1 %v3751_v60  ;;  %v2786_v41 = vpop.permute.xlu0 %2785  ;;  %v995_v51 = vsel %vm968_vm3, %v962_v13, %v2782_v8  ;;  %v996_v16 = vsel %vm968_vm3, %v963_v29, %v2783_v44  ;;  %v2803_v33 = vunpack.i.h.bf16 %v2801_v25  ;;  %v2802_v62 = vunpack.i.l.bf16 %v2801_v25 }
  0xe5   : > { %v2788_v18 = vunpack.i.h.bf16 %v2786_v41  ;;  %v2787_v19 = vunpack.i.l.bf16 %v2786_v41  ;;  %v3769_v22 = vpack.c.bf16 %v996_v16, %v995_v51 }
  0xe6   : > { %v934_v37 = vsel %vm902_vm1, %v3503_v24, %v2803_v33 }
  0xe7   : > { %v932_v5 = vsel %vm902_vm1, %v3507_v26, %v2788_v18  ;;  %v931_v7 = vsel %vm902_vm1, %v3469_v63, %v2787_v19  ;;  %v2811_v3 = vpop.permute.xlu1 %2810 }
  0xe8   : > { %v2796_v23 = vpop.permute.xlu0 %2795  ;;  %v964_v32 = vsel %vm935_vm2, %v931_v7, %v2792_v30  ;;  %v965_v12 = vsel %vm935_vm2, %v932_v5, %v2793_v57  ;;  %v2813_v47 = vunpack.i.h.bf16 %v2811_v3  ;;  %v2812_v48 = vunpack.i.l.bf16 %v2811_v3 }
  0xe9   : > { %v2798_v27 = vunpack.i.h.bf16 %v2796_v23  ;;  %v2797_v28 = vunpack.i.l.bf16 %v2796_v23 }
  0xeb   : > { %1564 = vmatmul.mubr.bf16.gmra.mrb[32].mxu0 %v3699_v36  ;;  %1757 = vmatmul.mubr.bf16.gmra.mrb[32].mxu1 %v3699_v36  ;;  %v997_v26 = vsel %vm968_vm3, %v964_v32, %v2797_v28  ;;  %v998_v35 = vsel %vm968_vm3, %v965_v12, %v2798_v27  ;;  %v933_v36 = vsel %vm902_vm1, %v3512_v31, %v2802_v62  ;;  %v2821_v10 = vpop.permute.xlu1 %2820 }
  0xec   : > { %1573 = vmatprep.mubr.bf16.mxu0 %v3769_v22  ;;  %1766 = vmatprep.mubr.bf16.mxu1 %v3769_v22  ;;  %v2806_v63 = vpop.permute.xlu0 %2805  ;;  %v3783_v43 = vpack.c.bf16 %v998_v35, %v997_v26  ;;  %v2823_v53 = vunpack.i.h.bf16 %v2821_v10  ;;  %v2822_v54 = vunpack.i.l.bf16 %v2821_v10 }
  0xed   : > { %v2808_v15 = vunpack.i.h.bf16 %v2806_v63  ;;  %v2807_v6 = vunpack.i.l.bf16 %v2806_v63 }
  0xef   : > { %v967_v49 = vsel %vm935_vm2, %v934_v37, %v2808_v15  ;;  %v966_v50 = vsel %vm935_vm2, %v933_v36, %v2807_v6  ;;  %v2831_v34 = vpop.permute.xlu1 %2830 }
  0xf0   : > { %v2816_v45 = vpop.permute.xlu0 %2815  ;;  %v999_v24 = vsel %vm968_vm3, %v966_v50, %v2812_v48  ;;  %v1000_v31 = vsel %vm968_vm3, %v967_v49, %v2813_v47  ;;  %v2833_v8 = vunpack.i.h.bf16 %v2831_v34  ;;  %v2832_v11 = vunpack.i.l.bf16 %v2831_v34 }
  0xf1   : > { %v2818_v21 = vunpack.i.h.bf16 %v2816_v45  ;;  %v2817_v52 = vunpack.i.l.bf16 %v2816_v45 }
  0xf2   : > { %v1004_v51 = vsel %vm902_vm1, %v3537_v59, %v2833_v8  ;;  %v1003_v16 = vsel %vm902_vm1, %v3547_v4, %v2832_v11 }
  0xf3   : > { %1574 = vmatmul.mubr.bf16.gmra.mrb[36].mxu0 %v3711_v56  ;;  %1767 = vmatmul.mubr.bf16.gmra.mrb[36].mxu1 %v3711_v56  ;;  %v1002_v55 = vsel %vm902_vm1, %v3542_v0, %v2818_v21  ;;  %v1001_v38 = vsel %vm902_vm1, %v3534_v58, %v2817_v52  ;;  %v3797_v56 = vpack.c.bf16 %v1000_v31, %v999_v24  ;;  %v2841_v41 = vpop.permute.xlu1 %2840  ;;  %v1111_v31 = vlaneseq }
  0xf4   : > { %1583 = vmatprep.mubr.bf16.mxu0 %v3783_v43  ;;  %1776 = vmatprep.mubr.bf16.mxu1 %v3783_v43  ;;  %v2826_v9 = vpop.permute.xlu0 %2825  ;;  %v1009_v2 = vsel %vm935_vm2, %v1001_v38, %v2822_v54  ;;  %v1010_v14 = vsel %vm935_vm2, %v1002_v55, %v2823_v53  ;;  %v2843_v19 = vunpack.i.h.bf16 %v2841_v41  ;;  %v2842_v57 = vunpack.i.l.bf16 %v2841_v41 }
  0xf5   : > { %v2828_v61 = vunpack.i.h.bf16 %v2826_v9  ;;  %v2827_v1 = vunpack.i.l.bf16 %v2826_v9  ;;  %v1109_v9 = vld [vmem:[%s4274_s2] sm:$0xf] }
  0xf7   : > { %v1017_v58 = vsel %vm968_vm3, %v1009_v2, %v2827_v1  ;;  %v1018_v0 = vsel %vm968_vm3, %v1010_v14, %v2828_v61  ;;  %v2851_v7 = vpop.permute.xlu1 %2850 }
  0xf8   : > { %v2836_v44 = vpop.permute.xlu0 %2835  ;;  %v2853_v27 = vunpack.i.h.bf16 %v2851_v7  ;;  %v2852_v28 = vunpack.i.l.bf16 %v2851_v7 }
  0xf9   : > { %v2838_v29 = vunpack.i.h.bf16 %v2836_v44  ;;  %v2837_v13 = vunpack.i.l.bf16 %v2836_v44 }
  0xfb   : > { %1584 = vmatmul.mubr.bf16.gmra.mrb[40].mxu0 %v3727_v20  ;;  %1777 = vmatmul.mubr.bf16.gmra.mrb[40].mxu1 %v3727_v20  ;;  %v1041_v20 = vpack.c.bf16 %v1018_v0, %v1017_v58  ;;  %v1012_v30 = vsel %vm935_vm2, %v1004_v51, %v2838_v29  ;;  %v1011_v5 = vsel %vm935_vm2, %v1003_v16, %v2837_v13  ;;  %v2861_v63 = vpop.permute.xlu1 %2860 }
  0xfc   : > { %1593 = vmatprep.mubr.bf16.mxu0 %v3797_v56  ;;  %1786 = vmatprep.mubr.bf16.mxu1 %v3797_v56  ;;  %v2846_v18 = vpop.permute.xlu0 %2845  ;;  %v1019_v59 = vsel %vm968_vm3, %v1011_v5, %v2842_v57  ;;  %v1020_v4 = vsel %vm968_vm3, %v1012_v30, %v2843_v19  ;;  %v2863_v6 = vunpack.i.h.bf16 %v2861_v63  ;;  %v2862_v3 = vunpack.i.l.bf16 %v2861_v63 }
  0xfd   : > { %v2848_v23 = vunpack.i.h.bf16 %v2846_v18  ;;  %v2847_v25 = vunpack.i.l.bf16 %v2846_v18  ;;  %v1042_v62 = vpack.c.bf16 %v1020_v4, %v1019_v59 }
  0xfe   : > { %v1008_v48 = vsel %vm902_vm1, %v3573_v39, %v2863_v6  ;;  %v1007_v49 = vsel %vm902_vm1, %v3582_v46, %v2862_v3 }
  0xff   : > { %v1006_v12 = vsel %vm902_vm1, %v3577_v42, %v2848_v23  ;;  %v1005_v33 = vsel %vm902_vm1, %v3555_v17, %v2847_v25  ;;  %v2871_v47 = vpop.permute.xlu1 %2870 }
 0x100   : > { %v2856_v32 = vpop.permute.xlu0 %2855  ;;  %v1013_v35 = vsel %vm935_vm2, %v1005_v33, %v2852_v28  ;;  %v1014_v15 = vsel %vm935_vm2, %v1006_v12, %v2853_v27  ;;  %v2872_v10 = vunpack.i.l.bf16 %v2871_v47 }
 0x101   : > { %v2857_v26 = vunpack.i.l.bf16 %v2856_v32 }
 0x103   : > { %1594 = vmatmul.mubr.bf16.gmra.mrb[44].mxu0 %v3737_v40  ;;  %1787 = vmatmul.mubr.bf16.gmra.mrb[44].mxu1 %v3737_v40  ;;  %v2858_v40 = vunpack.i.h.bf16 %v2856_v32  ;;  %v1021_v42 = vsel %vm968_vm3, %v1013_v35, %v2857_v26 }
 0x104   : > { %1603 = vmatprep.mubr.bf16.mxu0 %v1041_v20  ;;  %1796 = vmatprep.mubr.bf16.mxu1 %v1041_v20  ;;  %v2866_v37 = vpop.permute.xlu0 %2865 }
 0x105   : > { %v1022_v17 = vsel %vm968_vm3, %v1014_v15, %v2858_v40  ;;  %v2868_v36 = vunpack.i.h.bf16 %v2866_v37  ;;  %v2867_v45 = vunpack.i.l.bf16 %v2866_v37 }
 0x106   : > { %v1043_v50 = vpack.c.bf16 %v1022_v17, %v1021_v42 }
 0x107   : > { %v1016_v21 = vsel %vm935_vm2, %v1008_v48, %v2868_v36  ;;  %v1015_v52 = vsel %vm935_vm2, %v1007_v49, %v2867_v45 }
 0x108   : > { %v1023_v39 = vsel %vm968_vm3, %v1015_v52, %v2872_v10 }
 0x10b   : > { %1604 = vmatmul.mubr.bf16.gmra.mrb[48].mxu0 %v3751_v60  ;;  %1797 = vmatmul.mubr.bf16.gmra.mrb[48].mxu1 %v3751_v60  ;;  %v2873_v60 = vunpack.i.h.bf16 %v2871_v47 }
 0x10c   : > { %1613 = vmatprep.mubr.bf16.mxu0 %v1042_v62  ;;  %1806 = vmatprep.mubr.bf16.mxu1 %v1042_v62 }
 0x10d   : > { %v1024_v24 = vsel %vm968_vm3, %v1016_v21, %v2873_v60 }
 0x10e   : > { %v1044_v46 = vpack.c.bf16 %v1024_v24, %v1023_v39 }
 0x113   : > { %1614 = vmatmul.mubr.bf16.gmra.mrb[52].mxu0 %v3769_v22  ;;  %1807 = vmatmul.mubr.bf16.gmra.mrb[52].mxu1 %v3769_v22  ;;  %v1112_v22 = vshrl.u32 %v1111_v31, 7 }
 0x114   : > { %1623 = vmatprep.mubr.bf16.mxu0 %v1043_v50  ;;  %1816 = vmatprep.mubr.bf16.mxu1 %v1043_v50 }
 0x115   : > { %v1113_v53 = vsub.s32 0, %v1112_v22  ;;  %v1121_v54 = vsub.s32 2, %v1112_v22  ;;  %v1117_v55 = vsub.s32 1, %v1112_v22  ;;  %v1125_v38 = vsub.s32 3, %v1112_v22 }
 0x117   : > { %v3848_v34 = vrot.slane %v1109_v9, %v1121_v54  ;;  %v3853_v61 = vrot.slane %v1109_v9, %v1117_v55  ;;  %v3855_v1 = vrot.slane %v1109_v9, %v1125_v38 }
 0x11b   : > { %1624 = vmatmul.mubr.bf16.gmra.mrb[56].mxu0 %v3783_v43  ;;  %1817 = vmatmul.mubr.bf16.gmra.mrb[56].mxu1 %v3783_v43  ;;  %v3846_v43 = vrot.slane %v1109_v9, %v1113_v53 }
 0x11c   : > { %1633 = vmatprep.mubr.bf16.mxu0 %v1044_v46  ;;  %1826 = vmatprep.mubr.bf16.mxu1 %v1044_v46 }
 0x123   : > { %1634 = vmatmul.mubr.bf16.gmra.mrb[60].mxu0 %v3797_v56  ;;  %1827 = vmatmul.mubr.bf16.gmra.mrb[60].mxu1 %v3797_v56  ;;  %v1965_v56 = vld [vmem:[%s4275_s3] sm:$0xf] }
 0x124   : > { %v3860_v8 = vrot.slane %v1965_v56, %v1113_v53  ;;  %v3863_v58 = vrot.slane %v1965_v56, %v1121_v54  ;;  %v3866_v41 = vrot.slane %v1965_v56, %v1117_v55  ;;  %v3869_v16 = vrot.slane %v1965_v56, %v1125_v38 }
 0x172   : > { %v1485_v2 = vpop.f32.mrb[0].mxu0  ;;  %v1678_v14 = vpop.f32.mrb[0].mxu1 }
 0x173   : > { %v1486_v44 = vadd.f32 %v1485_v2, %v3846_v43  ;;  %v1679_v11 = vadd.f32 %v1678_v14, %v3848_v34  ;;  %v1487_v0 = vpop.f32.mrb[1].mxu0  ;;  %v1680_v29 = vpop.f32.mrb[1].mxu1 }
 0x174   : > { %v1488_v13 = vadd.f32 %v1487_v0, %v3853_v61  ;;  %v1681_v51 = vadd.f32 %v1680_v29, %v3855_v1  ;;  %v1489_v20 = vpop.f32.mrb[2].mxu0  ;;  %v1682_v18 = vpop.f32.mrb[2].mxu1 }
 0x175   : > { %v1837_v19 = vmul.f32 2.0, %v1486_v44  ;;  %v1839_v57 = vmul.f32 2.0, %v1679_v11  ;;  %v1490_v30 = vadd.f32 %v1489_v20, %v3846_v43  ;;  %v1683_v5 = vadd.f32 %v1682_v18, %v3848_v34  ;;  %v1491_v7 = vpop.f32.mrb[3].mxu0  ;;  %v1684_v23 = vpop.f32.mrb[3].mxu1 }
 0x176   : > { %v1838_v25 = vmul.f32 2.0, %v1488_v13  ;;  %v1840_v59 = vmul.f32 2.0, %v1681_v51  ;;  %v1492_v4 = vadd.f32 %v1491_v7, %v3853_v61  ;;  %v1685_v27 = vadd.f32 %v1684_v23, %v3855_v1 }
 0x177   : > { %v1987_v28 = vadd.f32 %v3860_v8, %v1837_v19  ;;  %v1989_v32 = vadd.f32 %v3863_v58, %v1839_v57  ;;  %v1841_v12 = vmul.f32 2.0, %v1490_v30  ;;  %v1843_v33 = vmul.f32 2.0, %v1683_v5 }
 0x178   : > { %v1988_v62 = vadd.f32 %v3866_v41, %v1838_v25  ;;  %v1990_v63 = vadd.f32 %v3869_v16, %v1840_v59  ;;  %v1842_v40 = vmul.f32 2.0, %v1492_v4  ;;  %v1844_v26 = vmul.f32 2.0, %v1685_v27 }
 0x179   : > { %v2115_v35 = vmul.f32 %v1987_v28, %v1486_v44  ;;  %v2117_v15 = vmul.f32 %v1989_v32, %v1679_v11  ;;  %v1991_v6 = vadd.f32 %v3860_v8, %v1841_v12  ;;  %v1993_v3 = vadd.f32 %v3863_v58, %v1843_v33 }
 0x17a   : > { %v2116_v37 = vmul.f32 %v1988_v62, %v1488_v13  ;;  %v2118_v42 = vmul.f32 %v1990_v63, %v1681_v51  ;;  %v1992_v17 = vadd.f32 %v3866_v41, %v1842_v40  ;;  %v1994_v36 = vadd.f32 %v3869_v16, %v1844_v26 }
 0x17b   : > { %2243 = vst [vmem:[%s3881_s14] sm:$0xff] %v2115_v35  ;;  %2245 = vst [vmem:[%s3881_s14 + $0x10] sm:$0xff] %v2117_v15  ;;  %v2119_v45 = vmul.f32 %v1991_v6, %v1490_v30  ;;  %v2121_v47 = vmul.f32 %v1993_v3, %v1683_v5 }
 0x17c   : > { %2244 = vst [vmem:[%s3881_s14 + $0x8] sm:$0xff] %v2116_v37  ;;  %2246 = vst [vmem:[%s3881_s14 + $0x18] sm:$0xff] %v2118_v42  ;;  %v2120_v48 = vmul.f32 %v1992_v17, %v1492_v4  ;;  %v2122_v49 = vmul.f32 %v1994_v36, %v1685_v27 }
 0x17d   : > { %2247 = vst [vmem:[%s3881_s14 + $0x20] sm:$0xff] %v2119_v45  ;;  %2249 = vst [vmem:[%s3881_s14 + $0x30] sm:$0xff] %v2121_v47 }
 0x17e   : > { %2248 = vst [vmem:[%s3881_s14 + $0x28] sm:$0xff] %v2120_v48  ;;  %2250 = vst [vmem:[%s3881_s14 + $0x38] sm:$0xff] %v2122_v49  ;;  %v1495_v50 = vpop.f32.mrb[4].mxu0  ;;  %v1688_v60 = vpop.f32.mrb[4].mxu1 }
 0x17f   : > { %v1496_v10 = vadd.f32 %v1495_v50, %v3846_v43  ;;  %v1689_v21 = vadd.f32 %v1688_v60, %v3848_v34  ;;  %v1497_v52 = vpop.f32.mrb[5].mxu0  ;;  %v1690_v39 = vpop.f32.mrb[5].mxu1 }
 0x180   : > { %v1498_v24 = vadd.f32 %v1497_v52, %v3853_v61  ;;  %v1691_v46 = vadd.f32 %v1690_v39, %v3855_v1  ;;  %v1499_v31 = vpop.f32.mrb[6].mxu0  ;;  %v1692_v22 = vpop.f32.mrb[6].mxu1 }
 0x181   : > { %v1845_v53 = vmul.f32 2.0, %v1496_v10  ;;  %v1847_v54 = vmul.f32 2.0, %v1689_v21  ;;  %v1500_v9 = vadd.f32 %v1499_v31, %v3846_v43  ;;  %v1693_v55 = vadd.f32 %v1692_v22, %v3848_v34  ;;  %v1501_v38 = vpop.f32.mrb[7].mxu0  ;;  %v1694_v56 = vpop.f32.mrb[7].mxu1 }
 0x182   : > { %v1846_v2 = vmul.f32 2.0, %v1498_v24  ;;  %v1848_v14 = vmul.f32 2.0, %v1691_v46  ;;  %v1502_v44 = vadd.f32 %v1501_v38, %v3853_v61  ;;  %v1695_v11 = vadd.f32 %v1694_v56, %v3855_v1 }
 0x183   : > { %v1995_v0 = vadd.f32 %v3860_v8, %v1845_v53  ;;  %v1997_v29 = vadd.f32 %v3863_v58, %v1847_v54  ;;  %v1849_v13 = vmul.f32 2.0, %v1500_v9  ;;  %v1851_v51 = vmul.f32 2.0, %v1693_v55 }
 0x184   : > { %v1996_v20 = vadd.f32 %v3866_v41, %v1846_v2  ;;  %v1998_v18 = vadd.f32 %v3869_v16, %v1848_v14  ;;  %v1850_v19 = vmul.f32 2.0, %v1502_v44  ;;  %v1852_v57 = vmul.f32 2.0, %v1695_v11 }
 0x185   : > { %v2123_v30 = vmul.f32 %v1995_v0, %v1496_v10  ;;  %v2125_v5 = vmul.f32 %v1997_v29, %v1689_v21  ;;  %v1999_v7 = vadd.f32 %v3860_v8, %v1849_v13  ;;  %v2001_v23 = vadd.f32 %v3863_v58, %v1851_v51 }
 0x186   : > { %v2124_v25 = vmul.f32 %v1996_v20, %v1498_v24  ;;  %v2126_v59 = vmul.f32 %v1998_v18, %v1691_v46  ;;  %v2000_v4 = vadd.f32 %v3866_v41, %v1850_v19  ;;  %v2002_v27 = vadd.f32 %v3869_v16, %v1852_v57 }
 0x187   : > { %2251 = vst [vmem:[%s3881_s14 + $0x40] sm:$0xff] %v2123_v30  ;;  %2253 = vst [vmem:[%s3881_s14 + $0x50] sm:$0xff] %v2125_v5  ;;  %v2127_v28 = vmul.f32 %v1999_v7, %v1500_v9  ;;  %v2129_v32 = vmul.f32 %v2001_v23, %v1693_v55 }
 0x188   : > { %2252 = vst [vmem:[%s3881_s14 + $0x48] sm:$0xff] %v2124_v25  ;;  %2254 = vst [vmem:[%s3881_s14 + $0x58] sm:$0xff] %v2126_v59  ;;  %v2128_v12 = vmul.f32 %v2000_v4, %v1502_v44  ;;  %v2130_v33 = vmul.f32 %v2002_v27, %v1695_v11 }
 0x189   : > { %2255 = vst [vmem:[%s3881_s14 + $0x60] sm:$0xff] %v2127_v28  ;;  %2257 = vst [vmem:[%s3881_s14 + $0x70] sm:$0xff] %v2129_v32 }
 0x18a   : > { %2256 = vst [vmem:[%s3881_s14 + $0x68] sm:$0xff] %v2128_v12  ;;  %2258 = vst [vmem:[%s3881_s14 + $0x78] sm:$0xff] %v2130_v33  ;;  %v1505_v62 = vpop.f32.mrb[8].mxu0  ;;  %v1698_v63 = vpop.f32.mrb[8].mxu1 }
 0x18b   : > { %v1506_v40 = vadd.f32 %v1505_v62, %v3846_v43  ;;  %v1699_v26 = vadd.f32 %v1698_v63, %v3848_v34  ;;  %v1507_v35 = vpop.f32.mrb[9].mxu0  ;;  %v1700_v15 = vpop.f32.mrb[9].mxu1 }
 0x18c   : > { %v1508_v6 = vadd.f32 %v1507_v35, %v3853_v61  ;;  %v1701_v3 = vadd.f32 %v1700_v15, %v3855_v1  ;;  %v1509_v37 = vpop.f32.mrb[10].mxu0  ;;  %v1702_v42 = vpop.f32.mrb[10].mxu1 }
 0x18d   : > { %v1853_v17 = vmul.f32 2.0, %v1506_v40  ;;  %v1855_v36 = vmul.f32 2.0, %v1699_v26  ;;  %v1510_v45 = vadd.f32 %v1509_v37, %v3846_v43  ;;  %v1703_v47 = vadd.f32 %v1702_v42, %v3848_v34  ;;  %v1511_v48 = vpop.f32.mrb[11].mxu0  ;;  %v1704_v49 = vpop.f32.mrb[11].mxu1 }
 0x18e   : > { %v1854_v50 = vmul.f32 2.0, %v1508_v6  ;;  %v1856_v60 = vmul.f32 2.0, %v1701_v3  ;;  %v1512_v10 = vadd.f32 %v1511_v48, %v3853_v61  ;;  %v1705_v21 = vadd.f32 %v1704_v49, %v3855_v1 }
 0x18f   : > { %v2003_v52 = vadd.f32 %v3860_v8, %v1853_v17  ;;  %v2005_v39 = vadd.f32 %v3863_v58, %v1855_v36  ;;  %v1857_v24 = vmul.f32 2.0, %v1510_v45  ;;  %v1859_v46 = vmul.f32 2.0, %v1703_v47 }
 0x190   : > { %v2004_v31 = vadd.f32 %v3866_v41, %v1854_v50  ;;  %v2006_v22 = vadd.f32 %v3869_v16, %v1856_v60  ;;  %v1858_v53 = vmul.f32 2.0, %v1512_v10  ;;  %v1860_v54 = vmul.f32 2.0, %v1705_v21 }
 0x191   : > { %v2131_v9 = vmul.f32 %v2003_v52, %v1506_v40  ;;  %v2133_v55 = vmul.f32 %v2005_v39, %v1699_v26  ;;  %v2007_v38 = vadd.f32 %v3860_v8, %v1857_v24  ;;  %v2009_v56 = vadd.f32 %v3863_v58, %v1859_v46 }
 0x192   : > { %v2132_v2 = vmul.f32 %v2004_v31, %v1508_v6  ;;  %v2134_v14 = vmul.f32 %v2006_v22, %v1701_v3  ;;  %v2008_v44 = vadd.f32 %v3866_v41, %v1858_v53  ;;  %v2010_v11 = vadd.f32 %v3869_v16, %v1860_v54 }
 0x193   : > { %2259 = vst [vmem:[%s3881_s14 + $0x80] sm:$0xff] %v2131_v9  ;;  %2261 = vst [vmem:[%s3881_s14 + $0x90] sm:$0xff] %v2133_v55  ;;  %v2135_v0 = vmul.f32 %v2007_v38, %v1510_v45  ;;  %v2137_v29 = vmul.f32 %v2009_v56, %v1703_v47 }
 0x194   : > { %2260 = vst [vmem:[%s3881_s14 + $0x88] sm:$0xff] %v2132_v2  ;;  %2262 = vst [vmem:[%s3881_s14 + $0x98] sm:$0xff] %v2134_v14  ;;  %v2136_v13 = vmul.f32 %v2008_v44, %v1512_v10  ;;  %v2138_v51 = vmul.f32 %v2010_v11, %v1705_v21 }
 0x195   : > { %2263 = vst [vmem:[%s3881_s14 + $0xa0] sm:$0xff] %v2135_v0  ;;  %2265 = vst [vmem:[%s3881_s14 + $0xb0] sm:$0xff] %v2137_v29 }
 0x196   : > { %2264 = vst [vmem:[%s3881_s14 + $0xa8] sm:$0xff] %v2136_v13  ;;  %2266 = vst [vmem:[%s3881_s14 + $0xb8] sm:$0xff] %v2138_v51  ;;  %v1515_v20 = vpop.f32.mrb[12].mxu0  ;;  %v1708_v18 = vpop.f32.mrb[12].mxu1 }
 0x197   : > { %v1516_v19 = vadd.f32 %v1515_v20, %v3846_v43  ;;  %v1709_v57 = vadd.f32 %v1708_v18, %v3848_v34  ;;  %v1517_v30 = vpop.f32.mrb[13].mxu0  ;;  %v1710_v5 = vpop.f32.mrb[13].mxu1 }
 0x198   : > { %v1518_v7 = vadd.f32 %v1517_v30, %v3853_v61  ;;  %v1711_v23 = vadd.f32 %v1710_v5, %v3855_v1  ;;  %v1519_v25 = vpop.f32.mrb[14].mxu0  ;;  %v1712_v59 = vpop.f32.mrb[14].mxu1 }
 0x199   : > { %v1861_v4 = vmul.f32 2.0, %v1516_v19  ;;  %v1863_v27 = vmul.f32 2.0, %v1709_v57  ;;  %v1520_v28 = vadd.f32 %v1519_v25, %v3846_v43  ;;  %v1713_v32 = vadd.f32 %v1712_v59, %v3848_v34  ;;  %v1521_v12 = vpop.f32.mrb[15].mxu0  ;;  %v1714_v33 = vpop.f32.mrb[15].mxu1 }
 0x19a   : > { %v1862_v62 = vmul.f32 2.0, %v1518_v7  ;;  %v1864_v63 = vmul.f32 2.0, %v1711_v23  ;;  %v1522_v40 = vadd.f32 %v1521_v12, %v3853_v61  ;;  %v1715_v26 = vadd.f32 %v1714_v33, %v3855_v1 }
 0x19b   : > { %v2011_v35 = vadd.f32 %v3860_v8, %v1861_v4  ;;  %v2013_v15 = vadd.f32 %v3863_v58, %v1863_v27  ;;  %v1865_v6 = vmul.f32 2.0, %v1520_v28  ;;  %v1867_v3 = vmul.f32 2.0, %v1713_v32 }
 0x19c   : > { %v2012_v37 = vadd.f32 %v3866_v41, %v1862_v62  ;;  %v2014_v42 = vadd.f32 %v3869_v16, %v1864_v63  ;;  %v1866_v17 = vmul.f32 2.0, %v1522_v40  ;;  %v1868_v36 = vmul.f32 2.0, %v1715_v26 }
 0x19d   : > { %v2139_v45 = vmul.f32 %v2011_v35, %v1516_v19  ;;  %v2141_v47 = vmul.f32 %v2013_v15, %v1709_v57  ;;  %v2015_v48 = vadd.f32 %v3860_v8, %v1865_v6  ;;  %v2017_v49 = vadd.f32 %v3863_v58, %v1867_v3 }
 0x19e   : > { %v2140_v50 = vmul.f32 %v2012_v37, %v1518_v7  ;;  %v2142_v60 = vmul.f32 %v2014_v42, %v1711_v23  ;;  %v2016_v10 = vadd.f32 %v3866_v41, %v1866_v17  ;;  %v2018_v21 = vadd.f32 %v3869_v16, %v1868_v36  ;;  %v1525_v52 = vpop.f32.mrb[16].mxu0  ;;  %v1718_v39 = vpop.f32.mrb[16].mxu1 }
 0x19f   : > { %2267 = vst [vmem:[%s3881_s14 + $0xc0] sm:$0xff] %v2139_v45  ;;  %2269 = vst [vmem:[%s3881_s14 + $0xd0] sm:$0xff] %v2141_v47  ;;  %v2143_v24 = vmul.f32 %v2015_v48, %v1520_v28  ;;  %v2145_v46 = vmul.f32 %v2017_v49, %v1713_v32  ;;  %v1526_v31 = vadd.f32 %v1525_v52, %v3846_v43  ;;  %v1527_v53 = vpop.f32.mrb[17].mxu0  ;;  %v1720_v54 = vpop.f32.mrb[17].mxu1 }
 0x1a0   : > { %v1719_v22 = vadd.f32 %v1718_v39, %v3848_v34  ;;  %2268 = vst [vmem:[%s3881_s14 + $0xc8] sm:$0xff] %v2140_v50  ;;  %2270 = vst [vmem:[%s3881_s14 + $0xd8] sm:$0xff] %v2142_v60  ;;  %v2144_v9 = vmul.f32 %v2016_v10, %v1522_v40  ;;  %v2146_v55 = vmul.f32 %v2018_v21, %v1715_v26  ;;  %v1529_v2 = vpop.f32.mrb[18].mxu0  ;;  %v1722_v14 = vpop.f32.mrb[18].mxu1 }
 0x1a1   : > { %v1528_v38 = vadd.f32 %v1527_v53, %v3853_v61  ;;  %v1721_v56 = vadd.f32 %v1720_v54, %v3855_v1  ;;  %2271 = vst [vmem:[%s3881_s14 + $0xe0] sm:$0xff] %v2143_v24  ;;  %2273 = vst [vmem:[%s3881_s14 + $0xf0] sm:$0xff] %v2145_v46  ;;  %v1869_v44 = vmul.f32 2.0, %v1526_v31  ;;  %v1530_v0 = vadd.f32 %v1529_v2, %v3846_v43  ;;  %v1531_v13 = vpop.f32.mrb[19].mxu0  ;;  %v1724_v51 = vpop.f32.mrb[19].mxu1 }
 0x1a2   : > { %v1871_v11 = vmul.f32 2.0, %v1719_v22  ;;  %v1723_v29 = vadd.f32 %v1722_v14, %v3848_v34  ;;  %2272 = vst [vmem:[%s3881_s14 + $0xe8] sm:$0xff] %v2144_v9  ;;  %2274 = vst [vmem:[%s3881_s14 + $0xf8] sm:$0xff] %v2146_v55  ;;  %v1532_v19 = vadd.f32 %v1531_v13, %v3853_v61  ;;  %v1725_v57 = vadd.f32 %v1724_v51, %v3855_v1 }
 0x1a3   : > { %v1870_v20 = vmul.f32 2.0, %v1528_v38  ;;  %v1872_v18 = vmul.f32 2.0, %v1721_v56  ;;  %v2019_v30 = vadd.f32 %v3860_v8, %v1869_v44  ;;  %v1873_v7 = vmul.f32 2.0, %v1530_v0 }
 0x1a4   : > { %v2021_v5 = vadd.f32 %v3863_v58, %v1871_v11  ;;  %v1875_v23 = vmul.f32 2.0, %v1723_v29  ;;  %v1874_v4 = vmul.f32 2.0, %v1532_v19  ;;  %v1876_v27 = vmul.f32 2.0, %v1725_v57 }
 0x1a5   : > { %v2020_v25 = vadd.f32 %v3866_v41, %v1870_v20  ;;  %v2022_v59 = vadd.f32 %v3869_v16, %v1872_v18  ;;  %v2147_v28 = vmul.f32 %v2019_v30, %v1526_v31  ;;  %v2023_v12 = vadd.f32 %v3860_v8, %v1873_v7 }
 0x1a6   : > { %v2149_v32 = vmul.f32 %v2021_v5, %v1719_v22  ;;  %v2025_v33 = vadd.f32 %v3863_v58, %v1875_v23  ;;  %v2024_v40 = vadd.f32 %v3866_v41, %v1874_v4  ;;  %v2026_v26 = vadd.f32 %v3869_v16, %v1876_v27  ;;  %v1535_v35 = vpop.f32.mrb[20].mxu0  ;;  %v1728_v15 = vpop.f32.mrb[20].mxu1 }
 0x1a7   : > { %v2148_v62 = vmul.f32 %v2020_v25, %v1528_v38  ;;  %v2150_v63 = vmul.f32 %v2022_v59, %v1721_v56  ;;  %2275 = vst [vmem:[%s3881_s14 + $0x100] sm:$0xff] %v2147_v28  ;;  %v2151_v6 = vmul.f32 %v2023_v12, %v1530_v0  ;;  %v1536_v37 = vadd.f32 %v1535_v35, %v3846_v43  ;;  %v1537_v17 = vpop.f32.mrb[21].mxu0  ;;  %v1730_v36 = vpop.f32.mrb[21].mxu1 }
 0x1a8   : > { %2277 = vst [vmem:[%s3881_s14 + $0x110] sm:$0xff] %v2149_v32  ;;  %v2153_v3 = vmul.f32 %v2025_v33, %v1723_v29  ;;  %v1729_v42 = vadd.f32 %v1728_v15, %v3848_v34  ;;  %v2152_v45 = vmul.f32 %v2024_v40, %v1532_v19  ;;  %v2154_v47 = vmul.f32 %v2026_v26, %v1725_v57  ;;  %v1539_v50 = vpop.f32.mrb[22].mxu0  ;;  %v1732_v60 = vpop.f32.mrb[22].mxu1 }
 0x1a9   : > { %2276 = vst [vmem:[%s3881_s14 + $0x108] sm:$0xff] %v2148_v62  ;;  %2278 = vst [vmem:[%s3881_s14 + $0x118] sm:$0xff] %v2150_v63  ;;  %v1538_v48 = vadd.f32 %v1537_v17, %v3853_v61  ;;  %v1731_v49 = vadd.f32 %v1730_v36, %v3855_v1  ;;  %v1877_v10 = vmul.f32 2.0, %v1536_v37  ;;  %v1540_v52 = vadd.f32 %v1539_v50, %v3846_v43  ;;  %v1541_v24 = vpop.f32.mrb[23].mxu0  ;;  %v1734_v46 = vpop.f32.mrb[23].mxu1 }
 0x1aa   : > { %2279 = vst [vmem:[%s3881_s14 + $0x120] sm:$0xff] %v2151_v6  ;;  %2281 = vst [vmem:[%s3881_s14 + $0x130] sm:$0xff] %v2153_v3  ;;  %v1879_v21 = vmul.f32 2.0, %v1729_v42  ;;  %v1733_v39 = vadd.f32 %v1732_v60, %v3848_v34  ;;  %v1542_v53 = vadd.f32 %v1541_v24, %v3853_v61  ;;  %v1735_v54 = vadd.f32 %v1734_v46, %v3855_v1 }
 0x1ab   : > { %2280 = vst [vmem:[%s3881_s14 + $0x128] sm:$0xff] %v2152_v45  ;;  %2282 = vst [vmem:[%s3881_s14 + $0x138] sm:$0xff] %v2154_v47  ;;  %v1878_v31 = vmul.f32 2.0, %v1538_v48  ;;  %v1880_v22 = vmul.f32 2.0, %v1731_v49  ;;  %v2027_v9 = vadd.f32 %v3860_v8, %v1877_v10  ;;  %v1881_v38 = vmul.f32 2.0, %v1540_v52 }
 0x1ac   : > { %v2029_v55 = vadd.f32 %v3863_v58, %v1879_v21  ;;  %v1883_v56 = vmul.f32 2.0, %v1733_v39  ;;  %v1882_v44 = vmul.f32 2.0, %v1542_v53  ;;  %v1884_v11 = vmul.f32 2.0, %v1735_v54 }
 0x1ad   : > { %v2028_v2 = vadd.f32 %v3866_v41, %v1878_v31  ;;  %v2030_v14 = vadd.f32 %v3869_v16, %v1880_v22  ;;  %v2155_v0 = vmul.f32 %v2027_v9, %v1536_v37  ;;  %v2031_v13 = vadd.f32 %v3860_v8, %v1881_v38 }
 0x1ae   : > { %v2157_v29 = vmul.f32 %v2029_v55, %v1729_v42  ;;  %v2033_v51 = vadd.f32 %v3863_v58, %v1883_v56  ;;  %v2032_v19 = vadd.f32 %v3866_v41, %v1882_v44  ;;  %v2034_v57 = vadd.f32 %v3869_v16, %v1884_v11  ;;  %v1545_v30 = vpop.f32.mrb[24].mxu0  ;;  %v1738_v5 = vpop.f32.mrb[24].mxu1 }
 0x1af   : > { %v2156_v20 = vmul.f32 %v2028_v2, %v1538_v48  ;;  %v2158_v18 = vmul.f32 %v2030_v14, %v1731_v49  ;;  %2283 = vst [vmem:[%s3881_s14 + $0x140] sm:$0xff] %v2155_v0  ;;  %v2159_v7 = vmul.f32 %v2031_v13, %v1540_v52  ;;  %v1546_v25 = vadd.f32 %v1545_v30, %v3846_v43  ;;  %v1547_v4 = vpop.f32.mrb[25].mxu0  ;;  %v1740_v27 = vpop.f32.mrb[25].mxu1 }
 0x1b0   : > { %2285 = vst [vmem:[%s3881_s14 + $0x150] sm:$0xff] %v2157_v29  ;;  %v2161_v23 = vmul.f32 %v2033_v51, %v1733_v39  ;;  %v1739_v59 = vadd.f32 %v1738_v5, %v3848_v34  ;;  %v2160_v28 = vmul.f32 %v2032_v19, %v1542_v53  ;;  %v2162_v32 = vmul.f32 %v2034_v57, %v1735_v54  ;;  %v1549_v62 = vpop.f32.mrb[26].mxu0  ;;  %v1742_v63 = vpop.f32.mrb[26].mxu1 }
 0x1b1   : > { %2284 = vst [vmem:[%s3881_s14 + $0x148] sm:$0xff] %v2156_v20  ;;  %2286 = vst [vmem:[%s3881_s14 + $0x158] sm:$0xff] %v2158_v18  ;;  %v1548_v12 = vadd.f32 %v1547_v4, %v3853_v61  ;;  %v1741_v33 = vadd.f32 %v1740_v27, %v3855_v1  ;;  %v1885_v40 = vmul.f32 2.0, %v1546_v25  ;;  %v1550_v35 = vadd.f32 %v1549_v62, %v3846_v43  ;;  %v1551_v6 = vpop.f32.mrb[27].mxu0  ;;  %v1744_v3 = vpop.f32.mrb[27].mxu1 }
 0x1b2   : > { %2287 = vst [vmem:[%s3881_s14 + $0x160] sm:$0xff] %v2159_v7  ;;  %2289 = vst [vmem:[%s3881_s14 + $0x170] sm:$0xff] %v2161_v23  ;;  %v1887_v26 = vmul.f32 2.0, %v1739_v59  ;;  %v1743_v15 = vadd.f32 %v1742_v63, %v3848_v34  ;;  %v1552_v17 = vadd.f32 %v1551_v6, %v3853_v61  ;;  %v1745_v36 = vadd.f32 %v1744_v3, %v3855_v1 }
 0x1b3   : > { %2288 = vst [vmem:[%s3881_s14 + $0x168] sm:$0xff] %v2160_v28  ;;  %2290 = vst [vmem:[%s3881_s14 + $0x178] sm:$0xff] %v2162_v32  ;;  %v1886_v37 = vmul.f32 2.0, %v1548_v12  ;;  %v1888_v42 = vmul.f32 2.0, %v1741_v33  ;;  %v2035_v45 = vadd.f32 %v3860_v8, %v1885_v40  ;;  %v1889_v48 = vmul.f32 2.0, %v1550_v35 }
 0x1b4   : > { %v2037_v47 = vadd.f32 %v3863_v58, %v1887_v26  ;;  %v1891_v49 = vmul.f32 2.0, %v1743_v15  ;;  %v1890_v10 = vmul.f32 2.0, %v1552_v17  ;;  %v1892_v21 = vmul.f32 2.0, %v1745_v36 }
 0x1b5   : > { %v2036_v50 = vadd.f32 %v3866_v41, %v1886_v37  ;;  %v2038_v60 = vadd.f32 %v3869_v16, %v1888_v42  ;;  %v2163_v52 = vmul.f32 %v2035_v45, %v1546_v25  ;;  %v2039_v24 = vadd.f32 %v3860_v8, %v1889_v48 }
 0x1b6   : > { %v2165_v39 = vmul.f32 %v2037_v47, %v1739_v59  ;;  %v2041_v46 = vadd.f32 %v3863_v58, %v1891_v49  ;;  %v2040_v53 = vadd.f32 %v3866_v41, %v1890_v10  ;;  %v2042_v54 = vadd.f32 %v3869_v16, %v1892_v21  ;;  %v1555_v9 = vpop.f32.mrb[28].mxu0  ;;  %v1748_v55 = vpop.f32.mrb[28].mxu1 }
 0x1b7   : > { %v2164_v31 = vmul.f32 %v2036_v50, %v1548_v12  ;;  %v2166_v22 = vmul.f32 %v2038_v60, %v1741_v33  ;;  %2291 = vst [vmem:[%s3881_s14 + $0x180] sm:$0xff] %v2163_v52  ;;  %v2167_v38 = vmul.f32 %v2039_v24, %v1550_v35  ;;  %v1556_v2 = vadd.f32 %v1555_v9, %v3846_v43  ;;  %v1557_v44 = vpop.f32.mrb[29].mxu0  ;;  %v1750_v11 = vpop.f32.mrb[29].mxu1 }
 0x1b8   : > { %2293 = vst [vmem:[%s3881_s14 + $0x190] sm:$0xff] %v2165_v39  ;;  %v2169_v56 = vmul.f32 %v2041_v46, %v1743_v15  ;;  %v1749_v14 = vadd.f32 %v1748_v55, %v3848_v34  ;;  %v2168_v0 = vmul.f32 %v2040_v53, %v1552_v17  ;;  %v2170_v29 = vmul.f32 %v2042_v54, %v1745_v36  ;;  %v1559_v20 = vpop.f32.mrb[30].mxu0  ;;  %v1752_v18 = vpop.f32.mrb[30].mxu1 }
 0x1b9   : > { %2292 = vst [vmem:[%s3881_s14 + $0x188] sm:$0xff] %v2164_v31  ;;  %2294 = vst [vmem:[%s3881_s14 + $0x198] sm:$0xff] %v2166_v22  ;;  %v1558_v13 = vadd.f32 %v1557_v44, %v3853_v61  ;;  %v1751_v51 = vadd.f32 %v1750_v11, %v3855_v1  ;;  %v1893_v19 = vmul.f32 2.0, %v1556_v2  ;;  %v1560_v30 = vadd.f32 %v1559_v20, %v3846_v43  ;;  %v1561_v7 = vpop.f32.mrb[31].mxu0  ;;  %v1754_v23 = vpop.f32.mrb[31].mxu1 }
 0x1ba   : > { %2295 = vst [vmem:[%s3881_s14 + $0x1a0] sm:$0xff] %v2167_v38  ;;  %2297 = vst [vmem:[%s3881_s14 + $0x1b0] sm:$0xff] %v2169_v56  ;;  %v1895_v57 = vmul.f32 2.0, %v1749_v14  ;;  %v1753_v5 = vadd.f32 %v1752_v18, %v3848_v34  ;;  %v1562_v4 = vadd.f32 %v1561_v7, %v3853_v61  ;;  %v1755_v27 = vadd.f32 %v1754_v23, %v3855_v1 }
 0x1bb   : > { %2296 = vst [vmem:[%s3881_s14 + $0x1a8] sm:$0xff] %v2168_v0  ;;  %2298 = vst [vmem:[%s3881_s14 + $0x1b8] sm:$0xff] %v2170_v29  ;;  %v1894_v25 = vmul.f32 2.0, %v1558_v13  ;;  %v1896_v59 = vmul.f32 2.0, %v1751_v51  ;;  %v2043_v28 = vadd.f32 %v3860_v8, %v1893_v19  ;;  %v1897_v12 = vmul.f32 2.0, %v1560_v30 }
 0x1bc   : > { %v2045_v32 = vadd.f32 %v3863_v58, %v1895_v57  ;;  %v1899_v33 = vmul.f32 2.0, %v1753_v5  ;;  %v1898_v40 = vmul.f32 2.0, %v1562_v4  ;;  %v1900_v26 = vmul.f32 2.0, %v1755_v27 }
 0x1bd   : > { %v2044_v62 = vadd.f32 %v3866_v41, %v1894_v25  ;;  %v2046_v63 = vadd.f32 %v3869_v16, %v1896_v59  ;;  %v2171_v35 = vmul.f32 %v2043_v28, %v1556_v2  ;;  %v2047_v6 = vadd.f32 %v3860_v8, %v1897_v12 }
 0x1be   : > { %v2173_v15 = vmul.f32 %v2045_v32, %v1749_v14  ;;  %v2049_v3 = vadd.f32 %v3863_v58, %v1899_v33  ;;  %v2048_v17 = vadd.f32 %v3866_v41, %v1898_v40  ;;  %v2050_v36 = vadd.f32 %v3869_v16, %v1900_v26  ;;  %v1565_v45 = vpop.f32.mrb[32].mxu0  ;;  %v1758_v47 = vpop.f32.mrb[32].mxu1 }
 0x1bf   : > { %v2172_v37 = vmul.f32 %v2044_v62, %v1558_v13  ;;  %v2174_v42 = vmul.f32 %v2046_v63, %v1751_v51  ;;  %2299 = vst [vmem:[%s3881_s14 + $0x1c0] sm:$0xff] %v2171_v35  ;;  %v2175_v48 = vmul.f32 %v2047_v6, %v1560_v30  ;;  %v1566_v50 = vadd.f32 %v1565_v45, %v3846_v43  ;;  %v1567_v10 = vpop.f32.mrb[33].mxu0  ;;  %v1760_v21 = vpop.f32.mrb[33].mxu1 }
 0x1c0   : > { %2301 = vst [vmem:[%s3881_s14 + $0x1d0] sm:$0xff] %v2173_v15  ;;  %v2177_v49 = vmul.f32 %v2049_v3, %v1753_v5  ;;  %v1759_v60 = vadd.f32 %v1758_v47, %v3848_v34  ;;  %v2176_v52 = vmul.f32 %v2048_v17, %v1562_v4  ;;  %v2178_v39 = vmul.f32 %v2050_v36, %v1755_v27  ;;  %v1569_v31 = vpop.f32.mrb[34].mxu0  ;;  %v1762_v22 = vpop.f32.mrb[34].mxu1 }
 0x1c1   : > { %2300 = vst [vmem:[%s3881_s14 + $0x1c8] sm:$0xff] %v2172_v37  ;;  %2302 = vst [vmem:[%s3881_s14 + $0x1d8] sm:$0xff] %v2174_v42  ;;  %v1568_v24 = vadd.f32 %v1567_v10, %v3853_v61  ;;  %v1761_v46 = vadd.f32 %v1760_v21, %v3855_v1  ;;  %v1901_v53 = vmul.f32 2.0, %v1566_v50  ;;  %v1570_v9 = vadd.f32 %v1569_v31, %v3846_v43  ;;  %v1571_v38 = vpop.f32.mrb[35].mxu0  ;;  %v1764_v56 = vpop.f32.mrb[35].mxu1 }
 0x1c2   : > { %2303 = vst [vmem:[%s3881_s14 + $0x1e0] sm:$0xff] %v2175_v48  ;;  %2305 = vst [vmem:[%s3881_s14 + $0x1f0] sm:$0xff] %v2177_v49  ;;  %v1903_v54 = vmul.f32 2.0, %v1759_v60  ;;  %v1763_v55 = vadd.f32 %v1762_v22, %v3848_v34  ;;  %v1572_v44 = vadd.f32 %v1571_v38, %v3853_v61  ;;  %v1765_v11 = vadd.f32 %v1764_v56, %v3855_v1 }
 0x1c3   : > { %2304 = vst [vmem:[%s3881_s14 + $0x1e8] sm:$0xff] %v2176_v52  ;;  %2306 = vst [vmem:[%s3881_s14 + $0x1f8] sm:$0xff] %v2178_v39  ;;  %v1902_v2 = vmul.f32 2.0, %v1568_v24  ;;  %v1904_v14 = vmul.f32 2.0, %v1761_v46  ;;  %v2051_v0 = vadd.f32 %v3860_v8, %v1901_v53  ;;  %v1905_v13 = vmul.f32 2.0, %v1570_v9 }
 0x1c4   : > { %v2053_v29 = vadd.f32 %v3863_v58, %v1903_v54  ;;  %v1907_v51 = vmul.f32 2.0, %v1763_v55  ;;  %v1906_v19 = vmul.f32 2.0, %v1572_v44  ;;  %v1908_v57 = vmul.f32 2.0, %v1765_v11 }
 0x1c5   : > { %v2052_v20 = vadd.f32 %v3866_v41, %v1902_v2  ;;  %v2054_v18 = vadd.f32 %v3869_v16, %v1904_v14  ;;  %v2179_v30 = vmul.f32 %v2051_v0, %v1566_v50  ;;  %v2055_v7 = vadd.f32 %v3860_v8, %v1905_v13 }
 0x1c6   : > { %v2181_v5 = vmul.f32 %v2053_v29, %v1759_v60  ;;  %v2057_v23 = vadd.f32 %v3863_v58, %v1907_v51  ;;  %v2056_v4 = vadd.f32 %v3866_v41, %v1906_v19  ;;  %v2058_v27 = vadd.f32 %v3869_v16, %v1908_v57  ;;  %v1575_v28 = vpop.f32.mrb[36].mxu0  ;;  %v1768_v32 = vpop.f32.mrb[36].mxu1 }
 0x1c7   : > { %v2180_v25 = vmul.f32 %v2052_v20, %v1568_v24  ;;  %v2182_v59 = vmul.f32 %v2054_v18, %v1761_v46  ;;  %2307 = vst [vmem:[%s3881_s14 + $0x200] sm:$0xff] %v2179_v30  ;;  %v2183_v12 = vmul.f32 %v2055_v7, %v1570_v9  ;;  %v1576_v62 = vadd.f32 %v1575_v28, %v3846_v43  ;;  %v1577_v40 = vpop.f32.mrb[37].mxu0  ;;  %v1770_v26 = vpop.f32.mrb[37].mxu1 }
 0x1c8   : > { %2309 = vst [vmem:[%s3881_s14 + $0x210] sm:$0xff] %v2181_v5  ;;  %v2185_v33 = vmul.f32 %v2057_v23, %v1763_v55  ;;  %v1769_v63 = vadd.f32 %v1768_v32, %v3848_v34  ;;  %v2184_v35 = vmul.f32 %v2056_v4, %v1572_v44  ;;  %v2186_v15 = vmul.f32 %v2058_v27, %v1765_v11  ;;  %v1579_v37 = vpop.f32.mrb[38].mxu0  ;;  %v1772_v42 = vpop.f32.mrb[38].mxu1 }
 0x1c9   : > { %2308 = vst [vmem:[%s3881_s14 + $0x208] sm:$0xff] %v2180_v25  ;;  %2310 = vst [vmem:[%s3881_s14 + $0x218] sm:$0xff] %v2182_v59  ;;  %v1578_v6 = vadd.f32 %v1577_v40, %v3853_v61  ;;  %v1771_v3 = vadd.f32 %v1770_v26, %v3855_v1  ;;  %v1909_v17 = vmul.f32 2.0, %v1576_v62  ;;  %v1580_v45 = vadd.f32 %v1579_v37, %v3846_v43  ;;  %v1581_v48 = vpop.f32.mrb[39].mxu0  ;;  %v1774_v49 = vpop.f32.mrb[39].mxu1 }
 0x1ca   : > { %2311 = vst [vmem:[%s3881_s14 + $0x220] sm:$0xff] %v2183_v12  ;;  %2313 = vst [vmem:[%s3881_s14 + $0x230] sm:$0xff] %v2185_v33  ;;  %v1911_v36 = vmul.f32 2.0, %v1769_v63  ;;  %v1773_v47 = vadd.f32 %v1772_v42, %v3848_v34  ;;  %v1582_v10 = vadd.f32 %v1581_v48, %v3853_v61  ;;  %v1775_v21 = vadd.f32 %v1774_v49, %v3855_v1 }
 0x1cb   : > { %2312 = vst [vmem:[%s3881_s14 + $0x228] sm:$0xff] %v2184_v35  ;;  %2314 = vst [vmem:[%s3881_s14 + $0x238] sm:$0xff] %v2186_v15  ;;  %v1910_v50 = vmul.f32 2.0, %v1578_v6  ;;  %v1912_v60 = vmul.f32 2.0, %v1771_v3  ;;  %v2059_v52 = vadd.f32 %v3860_v8, %v1909_v17  ;;  %v1913_v24 = vmul.f32 2.0, %v1580_v45 }
 0x1cc   : > { %v2061_v39 = vadd.f32 %v3863_v58, %v1911_v36  ;;  %v1915_v46 = vmul.f32 2.0, %v1773_v47  ;;  %v1914_v53 = vmul.f32 2.0, %v1582_v10  ;;  %v1916_v54 = vmul.f32 2.0, %v1775_v21 }
 0x1cd   : > { %v2060_v31 = vadd.f32 %v3866_v41, %v1910_v50  ;;  %v2062_v22 = vadd.f32 %v3869_v16, %v1912_v60  ;;  %v2187_v9 = vmul.f32 %v2059_v52, %v1576_v62  ;;  %v2063_v38 = vadd.f32 %v3860_v8, %v1913_v24 }
 0x1ce   : > { %v2189_v55 = vmul.f32 %v2061_v39, %v1769_v63  ;;  %v2065_v56 = vadd.f32 %v3863_v58, %v1915_v46  ;;  %v2064_v44 = vadd.f32 %v3866_v41, %v1914_v53  ;;  %v2066_v11 = vadd.f32 %v3869_v16, %v1916_v54  ;;  %v1585_v0 = vpop.f32.mrb[40].mxu0  ;;  %v1778_v29 = vpop.f32.mrb[40].mxu1 }
 0x1cf   : > { %v2188_v2 = vmul.f32 %v2060_v31, %v1578_v6  ;;  %v2190_v14 = vmul.f32 %v2062_v22, %v1771_v3  ;;  %2315 = vst [vmem:[%s3881_s14 + $0x240] sm:$0xff] %v2187_v9  ;;  %v2191_v13 = vmul.f32 %v2063_v38, %v1580_v45  ;;  %v1586_v20 = vadd.f32 %v1585_v0, %v3846_v43  ;;  %v1587_v19 = vpop.f32.mrb[41].mxu0  ;;  %v1780_v57 = vpop.f32.mrb[41].mxu1 }
 0x1d0   : > { %2317 = vst [vmem:[%s3881_s14 + $0x250] sm:$0xff] %v2189_v55  ;;  %v2193_v51 = vmul.f32 %v2065_v56, %v1773_v47  ;;  %v1779_v18 = vadd.f32 %v1778_v29, %v3848_v34  ;;  %v2192_v30 = vmul.f32 %v2064_v44, %v1582_v10  ;;  %v2194_v5 = vmul.f32 %v2066_v11, %v1775_v21  ;;  %v1589_v25 = vpop.f32.mrb[42].mxu0  ;;  %v1782_v59 = vpop.f32.mrb[42].mxu1 }
 0x1d1   : > { %2316 = vst [vmem:[%s3881_s14 + $0x248] sm:$0xff] %v2188_v2  ;;  %2318 = vst [vmem:[%s3881_s14 + $0x258] sm:$0xff] %v2190_v14  ;;  %v1588_v7 = vadd.f32 %v1587_v19, %v3853_v61  ;;  %v1781_v23 = vadd.f32 %v1780_v57, %v3855_v1  ;;  %v1917_v4 = vmul.f32 2.0, %v1586_v20  ;;  %v1590_v28 = vadd.f32 %v1589_v25, %v3846_v43  ;;  %v1591_v12 = vpop.f32.mrb[43].mxu0  ;;  %v1784_v33 = vpop.f32.mrb[43].mxu1 }
 0x1d2   : > { %2319 = vst [vmem:[%s3881_s14 + $0x260] sm:$0xff] %v2191_v13  ;;  %2321 = vst [vmem:[%s3881_s14 + $0x270] sm:$0xff] %v2193_v51  ;;  %v1919_v27 = vmul.f32 2.0, %v1779_v18  ;;  %v1783_v32 = vadd.f32 %v1782_v59, %v3848_v34  ;;  %v1592_v40 = vadd.f32 %v1591_v12, %v3853_v61  ;;  %v1785_v26 = vadd.f32 %v1784_v33, %v3855_v1 }
 0x1d3   : > { %2320 = vst [vmem:[%s3881_s14 + $0x268] sm:$0xff] %v2192_v30  ;;  %2322 = vst [vmem:[%s3881_s14 + $0x278] sm:$0xff] %v2194_v5  ;;  %v1918_v62 = vmul.f32 2.0, %v1588_v7  ;;  %v1920_v63 = vmul.f32 2.0, %v1781_v23  ;;  %v2067_v35 = vadd.f32 %v3860_v8, %v1917_v4  ;;  %v1921_v6 = vmul.f32 2.0, %v1590_v28 }
 0x1d4   : > { %v2069_v15 = vadd.f32 %v3863_v58, %v1919_v27  ;;  %v1923_v3 = vmul.f32 2.0, %v1783_v32  ;;  %v1922_v17 = vmul.f32 2.0, %v1592_v40  ;;  %v1924_v36 = vmul.f32 2.0, %v1785_v26 }
 0x1d5   : > { %v2068_v37 = vadd.f32 %v3866_v41, %v1918_v62  ;;  %v2070_v42 = vadd.f32 %v3869_v16, %v1920_v63  ;;  %v2195_v45 = vmul.f32 %v2067_v35, %v1586_v20  ;;  %v2071_v48 = vadd.f32 %v3860_v8, %v1921_v6 }
 0x1d6   : > { %v2197_v47 = vmul.f32 %v2069_v15, %v1779_v18  ;;  %v2073_v49 = vadd.f32 %v3863_v58, %v1923_v3  ;;  %v2072_v10 = vadd.f32 %v3866_v41, %v1922_v17  ;;  %v2074_v21 = vadd.f32 %v3869_v16, %v1924_v36  ;;  %v1595_v52 = vpop.f32.mrb[44].mxu0  ;;  %v1788_v39 = vpop.f32.mrb[44].mxu1 }
 0x1d7   : > { %v2196_v50 = vmul.f32 %v2068_v37, %v1588_v7  ;;  %v2198_v60 = vmul.f32 %v2070_v42, %v1781_v23  ;;  %2323 = vst [vmem:[%s3881_s14 + $0x280] sm:$0xff] %v2195_v45  ;;  %v2199_v24 = vmul.f32 %v2071_v48, %v1590_v28  ;;  %v1596_v31 = vadd.f32 %v1595_v52, %v3846_v43  ;;  %v1597_v53 = vpop.f32.mrb[45].mxu0  ;;  %v1790_v54 = vpop.f32.mrb[45].mxu1 }
 0x1d8   : > { %2325 = vst [vmem:[%s3881_s14 + $0x290] sm:$0xff] %v2197_v47  ;;  %v2201_v46 = vmul.f32 %v2073_v49, %v1783_v32  ;;  %v1789_v22 = vadd.f32 %v1788_v39, %v3848_v34  ;;  %v2200_v9 = vmul.f32 %v2072_v10, %v1592_v40  ;;  %v2202_v55 = vmul.f32 %v2074_v21, %v1785_v26  ;;  %v1599_v2 = vpop.f32.mrb[46].mxu0  ;;  %v1792_v14 = vpop.f32.mrb[46].mxu1 }
 0x1d9   : > { %2324 = vst [vmem:[%s3881_s14 + $0x288] sm:$0xff] %v2196_v50  ;;  %2326 = vst [vmem:[%s3881_s14 + $0x298] sm:$0xff] %v2198_v60  ;;  %v1598_v38 = vadd.f32 %v1597_v53, %v3853_v61  ;;  %v1791_v56 = vadd.f32 %v1790_v54, %v3855_v1  ;;  %v1925_v44 = vmul.f32 2.0, %v1596_v31  ;;  %v1600_v0 = vadd.f32 %v1599_v2, %v3846_v43  ;;  %v1601_v13 = vpop.f32.mrb[47].mxu0  ;;  %v1794_v51 = vpop.f32.mrb[47].mxu1 }
 0x1da   : > { %2327 = vst [vmem:[%s3881_s14 + $0x2a0] sm:$0xff] %v2199_v24  ;;  %2329 = vst [vmem:[%s3881_s14 + $0x2b0] sm:$0xff] %v2201_v46  ;;  %v1927_v11 = vmul.f32 2.0, %v1789_v22  ;;  %v1793_v29 = vadd.f32 %v1792_v14, %v3848_v34  ;;  %v1602_v19 = vadd.f32 %v1601_v13, %v3853_v61  ;;  %v1795_v57 = vadd.f32 %v1794_v51, %v3855_v1 }
 0x1db   : > { %2328 = vst [vmem:[%s3881_s14 + $0x2a8] sm:$0xff] %v2200_v9  ;;  %2330 = vst [vmem:[%s3881_s14 + $0x2b8] sm:$0xff] %v2202_v55  ;;  %v1926_v20 = vmul.f32 2.0, %v1598_v38  ;;  %v1928_v18 = vmul.f32 2.0, %v1791_v56  ;;  %v2075_v30 = vadd.f32 %v3860_v8, %v1925_v44  ;;  %v1929_v7 = vmul.f32 2.0, %v1600_v0 }
 0x1dc   : > { %v2077_v5 = vadd.f32 %v3863_v58, %v1927_v11  ;;  %v1931_v23 = vmul.f32 2.0, %v1793_v29  ;;  %v1930_v4 = vmul.f32 2.0, %v1602_v19  ;;  %v1932_v27 = vmul.f32 2.0, %v1795_v57 }
 0x1dd   : > { %v2076_v25 = vadd.f32 %v3866_v41, %v1926_v20  ;;  %v2078_v59 = vadd.f32 %v3869_v16, %v1928_v18  ;;  %v2203_v28 = vmul.f32 %v2075_v30, %v1596_v31  ;;  %v2079_v12 = vadd.f32 %v3860_v8, %v1929_v7 }
 0x1de   : > { %v2205_v32 = vmul.f32 %v2077_v5, %v1789_v22  ;;  %v2081_v33 = vadd.f32 %v3863_v58, %v1931_v23  ;;  %v2080_v40 = vadd.f32 %v3866_v41, %v1930_v4  ;;  %v2082_v26 = vadd.f32 %v3869_v16, %v1932_v27  ;;  %v1605_v35 = vpop.f32.mrb[48].mxu0  ;;  %v1798_v15 = vpop.f32.mrb[48].mxu1 }
 0x1df   : > { %v2204_v62 = vmul.f32 %v2076_v25, %v1598_v38  ;;  %v2206_v63 = vmul.f32 %v2078_v59, %v1791_v56  ;;  %2331 = vst [vmem:[%s3881_s14 + $0x2c0] sm:$0xff] %v2203_v28  ;;  %v2207_v6 = vmul.f32 %v2079_v12, %v1600_v0  ;;  %v1606_v37 = vadd.f32 %v1605_v35, %v3846_v43  ;;  %v1607_v17 = vpop.f32.mrb[49].mxu0  ;;  %v1800_v36 = vpop.f32.mrb[49].mxu1 }
 0x1e0   : > { %2333 = vst [vmem:[%s3881_s14 + $0x2d0] sm:$0xff] %v2205_v32  ;;  %v2209_v3 = vmul.f32 %v2081_v33, %v1793_v29  ;;  %v1799_v42 = vadd.f32 %v1798_v15, %v3848_v34  ;;  %v2208_v45 = vmul.f32 %v2080_v40, %v1602_v19  ;;  %v2210_v47 = vmul.f32 %v2082_v26, %v1795_v57  ;;  %v1609_v50 = vpop.f32.mrb[50].mxu0  ;;  %v1802_v60 = vpop.f32.mrb[50].mxu1 }
 0x1e1   : > { %2332 = vst [vmem:[%s3881_s14 + $0x2c8] sm:$0xff] %v2204_v62  ;;  %2334 = vst [vmem:[%s3881_s14 + $0x2d8] sm:$0xff] %v2206_v63  ;;  %v1608_v48 = vadd.f32 %v1607_v17, %v3853_v61  ;;  %v1801_v49 = vadd.f32 %v1800_v36, %v3855_v1  ;;  %v1933_v10 = vmul.f32 2.0, %v1606_v37  ;;  %v1610_v52 = vadd.f32 %v1609_v50, %v3846_v43  ;;  %v1611_v24 = vpop.f32.mrb[51].mxu0  ;;  %v1804_v46 = vpop.f32.mrb[51].mxu1 }
 0x1e2   : > { %2335 = vst [vmem:[%s3881_s14 + $0x2e0] sm:$0xff] %v2207_v6  ;;  %2337 = vst [vmem:[%s3881_s14 + $0x2f0] sm:$0xff] %v2209_v3  ;;  %v1935_v21 = vmul.f32 2.0, %v1799_v42  ;;  %v1803_v39 = vadd.f32 %v1802_v60, %v3848_v34  ;;  %v1612_v53 = vadd.f32 %v1611_v24, %v3853_v61  ;;  %v1805_v54 = vadd.f32 %v1804_v46, %v3855_v1 }
 0x1e3   : > { %2336 = vst [vmem:[%s3881_s14 + $0x2e8] sm:$0xff] %v2208_v45  ;;  %2338 = vst [vmem:[%s3881_s14 + $0x2f8] sm:$0xff] %v2210_v47  ;;  %v1934_v31 = vmul.f32 2.0, %v1608_v48  ;;  %v1936_v22 = vmul.f32 2.0, %v1801_v49  ;;  %v2083_v9 = vadd.f32 %v3860_v8, %v1933_v10  ;;  %v1937_v38 = vmul.f32 2.0, %v1610_v52 }
 0x1e4   : > { %v2085_v55 = vadd.f32 %v3863_v58, %v1935_v21  ;;  %v1939_v56 = vmul.f32 2.0, %v1803_v39  ;;  %v1938_v44 = vmul.f32 2.0, %v1612_v53  ;;  %v1940_v11 = vmul.f32 2.0, %v1805_v54 }
 0x1e5   : > { %v2084_v2 = vadd.f32 %v3866_v41, %v1934_v31  ;;  %v2086_v14 = vadd.f32 %v3869_v16, %v1936_v22  ;;  %v2211_v0 = vmul.f32 %v2083_v9, %v1606_v37  ;;  %v2087_v13 = vadd.f32 %v3860_v8, %v1937_v38 }
 0x1e6   : > { %v2213_v29 = vmul.f32 %v2085_v55, %v1799_v42  ;;  %v2089_v51 = vadd.f32 %v3863_v58, %v1939_v56  ;;  %v2088_v19 = vadd.f32 %v3866_v41, %v1938_v44  ;;  %v2090_v57 = vadd.f32 %v3869_v16, %v1940_v11  ;;  %v1615_v30 = vpop.f32.mrb[52].mxu0  ;;  %v1808_v5 = vpop.f32.mrb[52].mxu1 }
 0x1e7   : > { %v2212_v20 = vmul.f32 %v2084_v2, %v1608_v48  ;;  %v2214_v18 = vmul.f32 %v2086_v14, %v1801_v49  ;;  %2339 = vst [vmem:[%s3881_s14 + $0x300] sm:$0xff] %v2211_v0  ;;  %v2215_v7 = vmul.f32 %v2087_v13, %v1610_v52  ;;  %v1616_v25 = vadd.f32 %v1615_v30, %v3846_v43  ;;  %v1617_v4 = vpop.f32.mrb[53].mxu0  ;;  %v1810_v27 = vpop.f32.mrb[53].mxu1 }
 0x1e8   : > { %2341 = vst [vmem:[%s3881_s14 + $0x310] sm:$0xff] %v2213_v29  ;;  %v2217_v23 = vmul.f32 %v2089_v51, %v1803_v39  ;;  %v1809_v59 = vadd.f32 %v1808_v5, %v3848_v34  ;;  %v2216_v28 = vmul.f32 %v2088_v19, %v1612_v53  ;;  %v2218_v32 = vmul.f32 %v2090_v57, %v1805_v54  ;;  %v1619_v62 = vpop.f32.mrb[54].mxu0  ;;  %v1812_v63 = vpop.f32.mrb[54].mxu1 }
 0x1e9   : > { %2340 = vst [vmem:[%s3881_s14 + $0x308] sm:$0xff] %v2212_v20  ;;  %2342 = vst [vmem:[%s3881_s14 + $0x318] sm:$0xff] %v2214_v18  ;;  %v1618_v12 = vadd.f32 %v1617_v4, %v3853_v61  ;;  %v1811_v33 = vadd.f32 %v1810_v27, %v3855_v1  ;;  %v1941_v40 = vmul.f32 2.0, %v1616_v25  ;;  %v1620_v35 = vadd.f32 %v1619_v62, %v3846_v43  ;;  %v1621_v6 = vpop.f32.mrb[55].mxu0  ;;  %v1814_v3 = vpop.f32.mrb[55].mxu1 }
 0x1ea   : > { %2343 = vst [vmem:[%s3881_s14 + $0x320] sm:$0xff] %v2215_v7  ;;  %2345 = vst [vmem:[%s3881_s14 + $0x330] sm:$0xff] %v2217_v23  ;;  %v1943_v26 = vmul.f32 2.0, %v1809_v59  ;;  %v1813_v15 = vadd.f32 %v1812_v63, %v3848_v34  ;;  %v1622_v17 = vadd.f32 %v1621_v6, %v3853_v61  ;;  %v1815_v36 = vadd.f32 %v1814_v3, %v3855_v1 }
 0x1eb   : > { %2344 = vst [vmem:[%s3881_s14 + $0x328] sm:$0xff] %v2216_v28  ;;  %2346 = vst [vmem:[%s3881_s14 + $0x338] sm:$0xff] %v2218_v32  ;;  %v1942_v37 = vmul.f32 2.0, %v1618_v12  ;;  %v1944_v42 = vmul.f32 2.0, %v1811_v33  ;;  %v2091_v45 = vadd.f32 %v3860_v8, %v1941_v40  ;;  %v1945_v48 = vmul.f32 2.0, %v1620_v35 }
 0x1ec   : > { %v2093_v47 = vadd.f32 %v3863_v58, %v1943_v26  ;;  %v1947_v49 = vmul.f32 2.0, %v1813_v15  ;;  %v1946_v10 = vmul.f32 2.0, %v1622_v17  ;;  %v1948_v21 = vmul.f32 2.0, %v1815_v36 }
 0x1ed   : > { %v2092_v50 = vadd.f32 %v3866_v41, %v1942_v37  ;;  %v2094_v60 = vadd.f32 %v3869_v16, %v1944_v42  ;;  %v2219_v52 = vmul.f32 %v2091_v45, %v1616_v25  ;;  %v2095_v24 = vadd.f32 %v3860_v8, %v1945_v48 }
 0x1ee   : > { %v2221_v39 = vmul.f32 %v2093_v47, %v1809_v59  ;;  %v2097_v46 = vadd.f32 %v3863_v58, %v1947_v49  ;;  %v2096_v53 = vadd.f32 %v3866_v41, %v1946_v10  ;;  %v2098_v54 = vadd.f32 %v3869_v16, %v1948_v21  ;;  %v1625_v9 = vpop.f32.mrb[56].mxu0  ;;  %v1818_v55 = vpop.f32.mrb[56].mxu1 }
 0x1ef   : > { %v2220_v31 = vmul.f32 %v2092_v50, %v1618_v12  ;;  %v2222_v22 = vmul.f32 %v2094_v60, %v1811_v33  ;;  %2347 = vst [vmem:[%s3881_s14 + $0x340] sm:$0xff] %v2219_v52  ;;  %v2223_v38 = vmul.f32 %v2095_v24, %v1620_v35  ;;  %v1626_v2 = vadd.f32 %v1625_v9, %v3846_v43  ;;  %v1627_v44 = vpop.f32.mrb[57].mxu0  ;;  %v1820_v11 = vpop.f32.mrb[57].mxu1 }
 0x1f0   : > { %2349 = vst [vmem:[%s3881_s14 + $0x350] sm:$0xff] %v2221_v39  ;;  %v2225_v56 = vmul.f32 %v2097_v46, %v1813_v15  ;;  %v1819_v14 = vadd.f32 %v1818_v55, %v3848_v34  ;;  %v2224_v0 = vmul.f32 %v2096_v53, %v1622_v17  ;;  %v2226_v29 = vmul.f32 %v2098_v54, %v1815_v36  ;;  %v1629_v20 = vpop.f32.mrb[58].mxu0  ;;  %v1822_v18 = vpop.f32.mrb[58].mxu1 }
 0x1f1   : > { %2348 = vst [vmem:[%s3881_s14 + $0x348] sm:$0xff] %v2220_v31  ;;  %2350 = vst [vmem:[%s3881_s14 + $0x358] sm:$0xff] %v2222_v22  ;;  %v1628_v13 = vadd.f32 %v1627_v44, %v3853_v61  ;;  %v1821_v51 = vadd.f32 %v1820_v11, %v3855_v1  ;;  %v1949_v19 = vmul.f32 2.0, %v1626_v2  ;;  %v1630_v30 = vadd.f32 %v1629_v20, %v3846_v43  ;;  %v1631_v7 = vpop.f32.mrb[59].mxu0  ;;  %v1824_v23 = vpop.f32.mrb[59].mxu1 }
 0x1f2   : > { %2351 = vst [vmem:[%s3881_s14 + $0x360] sm:$0xff] %v2223_v38  ;;  %2353 = vst [vmem:[%s3881_s14 + $0x370] sm:$0xff] %v2225_v56  ;;  %v1951_v57 = vmul.f32 2.0, %v1819_v14  ;;  %v1823_v5 = vadd.f32 %v1822_v18, %v3848_v34  ;;  %v1632_v4 = vadd.f32 %v1631_v7, %v3853_v61  ;;  %v1825_v27 = vadd.f32 %v1824_v23, %v3855_v1 }
 0x1f3   : > { %2352 = vst [vmem:[%s3881_s14 + $0x368] sm:$0xff] %v2224_v0  ;;  %2354 = vst [vmem:[%s3881_s14 + $0x378] sm:$0xff] %v2226_v29  ;;  %v1950_v25 = vmul.f32 2.0, %v1628_v13  ;;  %v1952_v59 = vmul.f32 2.0, %v1821_v51  ;;  %v2099_v28 = vadd.f32 %v3860_v8, %v1949_v19  ;;  %v1953_v12 = vmul.f32 2.0, %v1630_v30 }
 0x1f4   : > { %v2101_v32 = vadd.f32 %v3863_v58, %v1951_v57  ;;  %v1955_v33 = vmul.f32 2.0, %v1823_v5  ;;  %v1954_v40 = vmul.f32 2.0, %v1632_v4  ;;  %v1956_v26 = vmul.f32 2.0, %v1825_v27 }
 0x1f5   : > { %v2100_v62 = vadd.f32 %v3866_v41, %v1950_v25  ;;  %v2102_v63 = vadd.f32 %v3869_v16, %v1952_v59  ;;  %v2227_v35 = vmul.f32 %v2099_v28, %v1626_v2  ;;  %v2103_v6 = vadd.f32 %v3860_v8, %v1953_v12 }
 0x1f6   : > { %v2229_v15 = vmul.f32 %v2101_v32, %v1819_v14  ;;  %v2105_v3 = vadd.f32 %v3863_v58, %v1955_v33  ;;  %v2104_v17 = vadd.f32 %v3866_v41, %v1954_v40  ;;  %v2106_v36 = vadd.f32 %v3869_v16, %v1956_v26  ;;  %v1635_v45 = vpop.f32.mrb[60].mxu0  ;;  %v1828_v47 = vpop.f32.mrb[60].mxu1 }
 0x1f7   : > { %v2228_v37 = vmul.f32 %v2100_v62, %v1628_v13  ;;  %v2230_v42 = vmul.f32 %v2102_v63, %v1821_v51  ;;  %2355 = vst [vmem:[%s3881_s14 + $0x380] sm:$0xff] %v2227_v35  ;;  %v2231_v48 = vmul.f32 %v2103_v6, %v1630_v30  ;;  %v1636_v50 = vadd.f32 %v1635_v45, %v3846_v43  ;;  %v1637_v10 = vpop.f32.mrb[61].mxu0  ;;  %v1830_v21 = vpop.f32.mrb[61].mxu1 }
 0x1f8   : > { %2357 = vst [vmem:[%s3881_s14 + $0x390] sm:$0xff] %v2229_v15  ;;  %v2233_v49 = vmul.f32 %v2105_v3, %v1823_v5  ;;  %v1829_v60 = vadd.f32 %v1828_v47, %v3848_v34  ;;  %v2232_v52 = vmul.f32 %v2104_v17, %v1632_v4  ;;  %v2234_v39 = vmul.f32 %v2106_v36, %v1825_v27  ;;  %v1639_v31 = vpop.f32.mrb[62].mxu0  ;;  %v1832_v22 = vpop.f32.mrb[62].mxu1 }
 0x1f9   : > { %2356 = vst [vmem:[%s3881_s14 + $0x388] sm:$0xff] %v2228_v37  ;;  %2358 = vst [vmem:[%s3881_s14 + $0x398] sm:$0xff] %v2230_v42  ;;  %v1638_v24 = vadd.f32 %v1637_v10, %v3853_v61  ;;  %v1831_v46 = vadd.f32 %v1830_v21, %v3855_v1  ;;  %v1957_v53 = vmul.f32 2.0, %v1636_v50  ;;  %v1640_v9 = vadd.f32 %v1639_v31, %v3846_v43  ;;  %v1641_v38 = vpop.f32.mrb[63].mxu0  ;;  %v1834_v56 = vpop.f32.mrb[63].mxu1 }
 0x1fa   : > { %2359 = vst [vmem:[%s3881_s14 + $0x3a0] sm:$0xff] %v2231_v48  ;;  %2361 = vst [vmem:[%s3881_s14 + $0x3b0] sm:$0xff] %v2233_v49  ;;  %v1959_v54 = vmul.f32 2.0, %v1829_v60  ;;  %v1833_v55 = vadd.f32 %v1832_v22, %v3848_v34  ;;  %v1642_v44 = vadd.f32 %v1641_v38, %v3853_v61  ;;  %v1835_v11 = vadd.f32 %v1834_v56, %v3855_v1 }
 0x1fb   : > { %2360 = vst [vmem:[%s3881_s14 + $0x3a8] sm:$0xff] %v2232_v52  ;;  %2362 = vst [vmem:[%s3881_s14 + $0x3b8] sm:$0xff] %v2234_v39  ;;  %v1958_v2 = vmul.f32 2.0, %v1638_v24  ;;  %v1960_v14 = vmul.f32 2.0, %v1831_v46  ;;  %v2107_v0 = vadd.f32 %v3860_v8, %v1957_v53  ;;  %v1961_v13 = vmul.f32 2.0, %v1640_v9 }
 0x1fc   : > { %v2109_v29 = vadd.f32 %v3863_v58, %v1959_v54  ;;  %v1963_v43 = vmul.f32 2.0, %v1833_v55  ;;  %v1962_v20 = vmul.f32 2.0, %v1642_v44  ;;  %v1964_v18 = vmul.f32 2.0, %v1835_v11 }
 0x1fd   : > { %v2108_v34 = vadd.f32 %v3866_v41, %v1958_v2  ;;  %v2110_v51 = vadd.f32 %v3869_v16, %v1960_v14  ;;  %v2235_v19 = vmul.f32 %v2107_v0, %v1636_v50  ;;  %v2111_v1 = vadd.f32 %v3860_v8, %v1961_v13 }
 0x1fe   : > { %v2237_v61 = vmul.f32 %v2109_v29, %v1829_v60  ;;  %v2113_v57 = vadd.f32 %v3863_v58, %v1963_v43  ;;  %v2112_v7 = vadd.f32 %v3866_v41, %v1962_v20  ;;  %v2114_v23 = vadd.f32 %v3869_v16, %v1964_v18 }
 0x1ff   : > { %v2236_v30 = vmul.f32 %v2108_v34, %v1638_v24  ;;  %v2238_v5 = vmul.f32 %v2110_v51, %v1831_v46  ;;  %2363 = vst [vmem:[%s3881_s14 + $0x3c0] sm:$0xff] %v2235_v19  ;;  %v2239_v25 = vmul.f32 %v2111_v1, %v1640_v9 }
 0x200   : > { %2365 = vst [vmem:[%s3881_s14 + $0x3d0] sm:$0xff] %v2237_v61  ;;  %v2241_v59 = vmul.f32 %v2113_v57, %v1833_v55  ;;  %v2240_v4 = vmul.f32 %v2112_v7, %v1642_v44  ;;  %v2242_v27 = vmul.f32 %v2114_v23, %v1835_v11 }
 0x201   : > { %2364 = vst [vmem:[%s3881_s14 + $0x3c8] sm:$0xff] %v2236_v30  ;;  %2366 = vst [vmem:[%s3881_s14 + $0x3d8] sm:$0xff] %v2238_v5 }
 0x202   : > { %2367 = vst [vmem:[%s3881_s14 + $0x3e0] sm:$0xff] %v2239_v25  ;;  %2369 = vst [vmem:[%s3881_s14 + $0x3f0] sm:$0xff] %v2241_v59 }
 0x203   : > { %2368 = vst [vmem:[%s3881_s14 + $0x3e8] sm:$0xff] %v2240_v4  ;;  %2370 = vst [vmem:[%s3881_s14 + $0x3f8] sm:$0xff] %v2242_v27 }
 0x204 PF: > { %s14_s19 = sadd.s32 1, %s3022_s19   ;;  %s4277_s15 = smov %s3014_s17 }
 0x205   : > { %p11_p7 = scmp.ge.s32.totalorder %s14_s19, 6   ;;  %s4278_s16 = smov %s3018_s18 }
 0x206   : > { %s4279_s17 = smov %s4282_s20  ;;  %s4280_s18 = smov %s4286_s21 }
 0x207   :  { %13 = sbr.rel (!%p11_p7) target bundleno = 3 (0x3), region = 67 }

</bundles_post_ra>
